<compile_context>
chip_gen: v6e
topology: v6e:2x2x1
jax: 0.10.0
libtpu: 0.0.40
codegen_flags: <defaults>
</compile_context>

<pallas_src>
import numpy as np
import jax
import jax.numpy as jnp
from jax import lax
from jax.experimental import pallas as pl
from jax.experimental.pallas import tpu as pltpu

F_PAD = 128          # lane-padded input feature dim
H_PAD = 128          # lane-padded hidden dim
C_PAD = 128          # lane-padded class dim
G_PAD = 4 * H_PAD    # concatenated (i,f,g,o) gate width
NEG_BIG = -1.0e30    # bias for padded class columns (ignored by log_softmax)


# ---------------- fused Pallas kernel ----------------

def _graphsage_fused_kernel(a_ref, x_ref, w1l_ref, b1l_ref, w1r_ref,
                            sel_ref, wih_ref, whh_ref, bg_ref,
                            w2l_ref, b2l_ref, w2r_ref,
                            o_ref, xp_scr):
    n = x_ref.shape[0]
    hp = whh_ref.shape[0]            # padded hidden width (128)
    t_len = sel_ref.shape[0] // n    # padded neighbour-sequence length

    # ---- conv1: mean aggregation (normalized adjacency) + SAGE combine + ELU
    x = x_ref[...]                                                      # (N, F_PAD)
    agg1 = jnp.dot(a_ref[...], x, preferred_element_type=jnp.float32)   # (N, F_PAD)
    pre1 = (jnp.dot(agg1, w1l_ref[...], preferred_element_type=jnp.float32)
            + jnp.dot(x, w1r_ref[...], preferred_element_type=jnp.float32)
            + b1l_ref[...])                                             # (N, H_PAD)
    h1 = jnp.where(pre1 > 0.0, pre1, jnp.exp(jnp.minimum(pre1, 0.0)) - 1.0)
    # F.dropout(p=0.0) is the identity.

    # ---- conv2 LSTM aggregation --------------------------------------------
    # Input projection hoisted out of the recurrence:
    #   xp[t*N + v] = seq[t, v] @ Wih_cat + (b_ih + b_hh)
    # with seq[t] = Sel_t @ h1 (one-hot neighbour selection rows).
    h1_proj = jnp.dot(h1, wih_ref[...], preferred_element_type=jnp.float32)   # (N, 4H)
    xp_scr[...] = (jnp.dot(sel_ref[...], h1_proj,
                           preferred_element_type=jnp.float32)
                   + bg_ref[...])                                             # (T*N, 4H)

    whh = whh_ref[...]                                                        # (H_PAD, 4H)

    def lstm_step(t, carry):
        h, c = carry
        base = pl.multiple_of(t * n, 8)
        gates = xp_scr[pl.ds(base, n), :] + jnp.dot(
            h, whh, preferred_element_type=jnp.float32)                       # (N, 4H)
        i_g = jax.nn.sigmoid(gates[:, 0 * hp:1 * hp])
        f_g = jax.nn.sigmoid(gates[:, 1 * hp:2 * hp])
        g_g = jnp.tanh(gates[:, 2 * hp:3 * hp])
        o_g = jax.nn.sigmoid(gates[:, 3 * hp:4 * hp])
        c_new = f_g * c + i_g * g_g
        h_new = o_g * jnp.tanh(c_new)
        return h_new, c_new

    h0 = jnp.zeros((n, hp), jnp.float32)
    c0 = jnp.zeros((n, hp), jnp.float32)
    h_fin, _ = lax.fori_loop(0, t_len, lstm_step, (h0, c0), unroll=True)

    # ---- conv2 SAGE combine + log_softmax (lane-padded, pad cols get -1e30)
    logits = (jnp.dot(h_fin, w2l_ref[...], preferred_element_type=jnp.float32)
              + jnp.dot(h1, w2r_ref[...], preferred_element_type=jnp.float32)
              + b2l_ref[...])                                            # (N, C_PAD)
    m = jnp.max(logits, axis=1, keepdims=True)
    shifted = logits - m
    lse = jnp.log(jnp.sum(jnp.exp(shifted), axis=1, keepdims=True))
    o_ref[...] = shifted - lse


# ---------------- wrapper ----------------

def _full_spec(shape):
    nd = len(shape)
    return pl.BlockSpec(shape, lambda i, nd=nd: (0,) * nd)


def graphsage_forward(a_norm, x_pad, sel_flat, params, n_classes):
    (w1l_t, b1l, w1r_t, wih_cat, whh_cat, b_cat, w2l_t, b2l, w2r_t) = params
    n = x_pad.shape[0]
    tn = sel_flat.shape[0]
    out_pad = pl.pallas_call(
        _graphsage_fused_kernel,
        out_shape=jax.ShapeDtypeStruct((n, C_PAD), jnp.float32),
        grid=(1,),
        in_specs=[_full_spec(a_norm.shape), _full_spec(x_pad.shape),
                  _full_spec(w1l_t.shape), _full_spec(b1l.shape),
                  _full_spec(w1r_t.shape),
                  _full_spec(sel_flat.shape),
                  _full_spec(wih_cat.shape), _full_spec(whh_cat.shape),
                  _full_spec(b_cat.shape),
                  _full_spec(w2l_t.shape), _full_spec(b2l.shape),
                  _full_spec(w2r_t.shape)],
        out_specs=_full_spec((n, C_PAD)),
        scratch_shapes=[pltpu.VMEM((tn, G_PAD), jnp.float32)],
        compiler_params=pltpu.CompilerParams(
            dimension_semantics=("arbitrary",)),
    )(a_norm, x_pad, w1l_t, b1l, w1r_t, sel_flat, wih_cat, whh_cat, b_cat,
      w2l_t, b2l, w2r_t)
    return out_pad[:, :n_classes]


# ---------------- main ----------------

if __name__ == "__main__":
    # sizes: N nodes, F_IN features, HID hidden, NCLS classes, E edges
    N, F_IN, HID, NCLS, E = 16, 8, 16, 4, 48

    # ---- deterministic synthetic graph (host-side glue) ----
    rng = np.random.RandomState(0)
    src = rng.randint(0, N, size=E).astype(np.int32)
    dst = rng.randint(0, N, size=E).astype(np.int32)
    # sort_edge_index(edge_index, sort_by_row=False): sort by dst, then src
    order = np.argsort(dst.astype(np.int64) * N + src.astype(np.int64), kind="stable")
    src, dst = src[order], dst[order]
    deg = np.bincount(dst, minlength=N)
    T = int(max(deg.max(), 1))                     # padded neighbour-sequence length
    ptr = np.concatenate([[0], np.cumsum(deg)])
    pos = (np.arange(E) - ptr[dst]).astype(np.int32)  # slot inside each dst's sequence

    adj = np.zeros((N, N), np.float32)
    np.add.at(adj, (dst, src), 1.0)
    a_norm = adj / np.maximum(deg, 1)[:, None]     # row-normalized => mean aggregation

    # per-timestep one-hot neighbour selection: seq[t] = sel[t] @ h1
    sel = np.zeros((T, N, N), np.float32)
    sel[pos, dst, src] = 1.0
    sel_flat = sel.reshape(T * N, N)

    a_norm_j = jnp.asarray(a_norm)
    sel_flat_j = jnp.asarray(sel_flat)
    src_j, dst_j, pos_j = jnp.asarray(src), jnp.asarray(dst), jnp.asarray(pos)

    # ---- deterministic parameters (SAGEConv / LSTM shapes) ----
    key = jax.random.PRNGKey(0)
    ks = jax.random.split(key, 12)

    def unif(k, shape, fan_in):
        s = 1.0 / np.sqrt(fan_in)
        return jax.random.uniform(k, shape, jnp.float32, -s, s)

    x = jax.random.normal(ks[0], (N, F_IN), jnp.float32)

    # conv1 = SAGEConv(F_IN, HID, aggr='mean'): lin_l (with bias), lin_r (no bias)
    w1l = unif(ks[1], (HID, F_IN), F_IN)
    b1l = unif(ks[2], (HID,), F_IN)
    w1r = unif(ks[3], (HID, F_IN), F_IN)
    # conv2 = SAGEConv(HID, NCLS, aggr='lstm'): LSTMAggregation(HID, HID) + lin_l/lin_r
    w_ih = unif(ks[4], (4 * HID, HID), HID)
    w_hh = unif(ks[5], (4 * HID, HID), HID)
    b_ih = unif(ks[6], (4 * HID,), HID)
    b_hh = unif(ks[7], (4 * HID,), HID)
    w2l = unif(ks[8], (NCLS, HID), HID)
    b2l = unif(ks[9], (NCLS,), HID)
    w2r = unif(ks[10], (NCLS, HID), HID)

    # ---- lane-padded parameter packing (host glue) ----
    def pad2(m, rows, cols):
        out = jnp.zeros((rows, cols), jnp.float32)
        return out.at[:m.shape[0], :m.shape[1]].set(m)

    x_pad   = pad2(x, N, F_PAD)
    w1l_t_p = pad2(w1l.T, F_PAD, H_PAD)
    w1r_t_p = pad2(w1r.T, F_PAD, H_PAD)
    b1l_p   = pad2(b1l[None, :], 1, H_PAD)

    # concatenated LSTM gate weights (PyTorch gate order i,f,g,o), lane-padded
    wih_cat = jnp.zeros((H_PAD, G_PAD), jnp.float32)
    whh_cat = jnp.zeros((H_PAD, G_PAD), jnp.float32)
    b_cat   = jnp.zeros((1, G_PAD), jnp.float32)
    for k in range(4):
        wih_cat = wih_cat.at[:HID, k * H_PAD:k * H_PAD + HID].set(
            w_ih[k * HID:(k + 1) * HID, :].T)
        whh_cat = whh_cat.at[:HID, k * H_PAD:k * H_PAD + HID].set(
            w_hh[k * HID:(k + 1) * HID, :].T)
        b_cat = b_cat.at[0, k * H_PAD:k * H_PAD + HID].set(
            b_ih[k * HID:(k + 1) * HID] + b_hh[k * HID:(k + 1) * HID])

    w2l_t_p = pad2(w2l.T, H_PAD, C_PAD)
    w2r_t_p = pad2(w2r.T, H_PAD, C_PAD)
    b2l_p   = jnp.full((1, C_PAD), NEG_BIG, jnp.float32).at[0, :NCLS].set(b2l)

    params = (w1l_t_p, b1l_p, w1r_t_p, wih_cat, whh_cat, b_cat,
              w2l_t_p, b2l_p, w2r_t_p)

    @jax.jit
    def fwd(a, xp, sel, *ps):
        return graphsage_forward(a, xp, sel, ps, NCLS)

    out = fwd(a_norm_j, x_pad, sel_flat_j, *params)
    jax.block_until_ready(out)

    # ---- pure-JAX reference for a sanity check ----
    def build_dense_seq(h):
        seq = jnp.zeros((T, N, HID), jnp.float32)
        return seq.at[pos_j, dst_j].set(h[src_j])

    def reference(x):
        agg1 = a_norm_j @ x
        h1 = agg1 @ w1l.T + b1l + x @ w1r.T
        h1 = jnp.where(h1 > 0.0, h1, jnp.exp(jnp.minimum(h1, 0.0)) - 1.0)
        seq = build_dense_seq(h1)
        h = jnp.zeros((N, HID), jnp.float32)
        c = jnp.zeros((N, HID), jnp.float32)
        for t in range(T):
            gates = seq[t] @ w_ih.T + b_ih + h @ w_hh.T + b_hh
            i_g = jax.nn.sigmoid(gates[:, :HID])
            f_g = jax.nn.sigmoid(gates[:, HID:2 * HID])
            g_g = jnp.tanh(gates[:, 2 * HID:3 * HID])
            o_g = jax.nn.sigmoid(gates[:, 3 * HID:4 * HID])
            c = f_g * c + i_g * g_g
            h = o_g * jnp.tanh(c)
        logits = h @ w2l.T + b2l + h1 @ w2r.T
        m = jnp.max(logits, axis=1, keepdims=True)
        sh = logits - m
        return sh - jnp.log(jnp.sum(jnp.exp(sh), axis=1, keepdims=True))

    with jax.default_matmul_precision("float32"):
        ref = jax.jit(reference)(x)
    np.testing.assert_allclose(np.asarray(out), np.asarray(ref), rtol=5e-3, atol=5e-3)

    print("KERNEL_OK")
</pallas_src>

<mosaic_0001>
module attributes {stable_mosaic.version = 11 : i64} {
  func.func @_graphsage_fused_kernel(%arg0: i32, %arg1: memref<16x16xf32, #tpu.memory_space<vmem>>, %arg2: memref<16x128xf32, #tpu.memory_space<vmem>>, %arg3: memref<128x128xf32, #tpu.memory_space<vmem>>, %arg4: memref<1x128xf32, #tpu.memory_space<vmem>>, %arg5: memref<128x128xf32, #tpu.memory_space<vmem>>, %arg6: memref<80x16xf32, #tpu.memory_space<vmem>>, %arg7: memref<128x512xf32, #tpu.memory_space<vmem>>, %arg8: memref<128x512xf32, #tpu.memory_space<vmem>>, %arg9: memref<1x512xf32, #tpu.memory_space<vmem>>, %arg10: memref<128x128xf32, #tpu.memory_space<vmem>>, %arg11: memref<1x128xf32, #tpu.memory_space<vmem>>, %arg12: memref<128x128xf32, #tpu.memory_space<vmem>>, %arg13: memref<16x128xf32, #tpu.memory_space<vmem>>, %arg14: memref<80x512xf32, #tpu.memory_space<vmem>>) attributes {dimension_semantics = [#tpu.dimension_semantics<arbitrary>], iteration_bounds = array<i64: 1>, scalar_prefetch = 0 : i64, scratch_operands = 1 : i64, tpu.core_type = #tpu.core_type<tc>, window_params = [{pipeline_mode = #tpu.pipeline_mode<synchronous>, transform_indices = @transform_0, window_bounds = array<i64: 16, 16>}, {pipeline_mode = #tpu.pipeline_mode<synchronous>, transform_indices = @transform_1, window_bounds = array<i64: 16, 128>}, {pipeline_mode = #tpu.pipeline_mode<synchronous>, transform_indices = @transform_2, window_bounds = array<i64: 128, 128>}, {pipeline_mode = #tpu.pipeline_mode<synchronous>, transform_indices = @transform_3, window_bounds = array<i64: 1, 128>}, {pipeline_mode = #tpu.pipeline_mode<synchronous>, transform_indices = @transform_4, window_bounds = array<i64: 128, 128>}, {pipeline_mode = #tpu.pipeline_mode<synchronous>, transform_indices = @transform_5, window_bounds = array<i64: 80, 16>}, {pipeline_mode = #tpu.pipeline_mode<synchronous>, transform_indices = @transform_6, window_bounds = array<i64: 128, 512>}, {pipeline_mode = #tpu.pipeline_mode<synchronous>, transform_indices = @transform_7, window_bounds = array<i64: 128, 512>}, {pipeline_mode = #tpu.pipeline_mode<synchronous>, transform_indices = @transform_8, window_bounds = array<i64: 1, 512>}, {pipeline_mode = #tpu.pipeline_mode<synchronous>, transform_indices = @transform_9, window_bounds = array<i64: 128, 128>}, {pipeline_mode = #tpu.pipeline_mode<synchronous>, transform_indices = @transform_10, window_bounds = array<i64: 1, 128>}, {pipeline_mode = #tpu.pipeline_mode<synchronous>, transform_indices = @transform_11, window_bounds = array<i64: 128, 128>}, {pipeline_mode = #tpu.pipeline_mode<synchronous>, transform_indices = @transform_12, window_bounds = array<i64: 16, 128>}]} {
    %c0 = arith.constant 0 : index
    %c0_0 = arith.constant 0 : index
    %0 = vector.load %arg2[%c0, %c0_0] : memref<16x128xf32, #tpu.memory_space<vmem>>, vector<16x128xf32>
    %c0_1 = arith.constant 0 : index
    %c0_2 = arith.constant 0 : index
    %1 = vector.load %arg1[%c0_1, %c0_2] : memref<16x16xf32, #tpu.memory_space<vmem>>, vector<16x16xf32>
    %cst = arith.constant dense<0.000000e+00> : vector<16x128xf32>
    %2 = tpu.matmul %1, %0, %cst {dimension_numbers = #tpu.dot_dimension_numbers<[1], [0], [0], [1], [0, 0, 1, 1], [], []>} : vector<16x16xf32>, vector<16x128xf32>, vector<16x128xf32> -> vector<16x128xf32>
    %c0_3 = arith.constant 0 : index
    %c0_4 = arith.constant 0 : index
    %3 = vector.load %arg3[%c0_3, %c0_4] : memref<128x128xf32, #tpu.memory_space<vmem>>, vector<128x128xf32>
    %cst_5 = arith.constant dense<0.000000e+00> : vector<16x128xf32>
    %4 = tpu.matmul %2, %3, %cst_5 {dimension_numbers = #tpu.dot_dimension_numbers<[1], [0], [0], [1], [0, 0, 1, 1], [], []>} : vector<16x128xf32>, vector<128x128xf32>, vector<16x128xf32> -> vector<16x128xf32>
    %c0_6 = arith.constant 0 : index
    %c0_7 = arith.constant 0 : index
    %5 = vector.load %arg5[%c0_6, %c0_7] : memref<128x128xf32, #tpu.memory_space<vmem>>, vector<128x128xf32>
    %cst_8 = arith.constant dense<0.000000e+00> : vector<16x128xf32>
    %6 = tpu.matmul %0, %5, %cst_8 {dimension_numbers = #tpu.dot_dimension_numbers<[1], [0], [0], [1], [0, 0, 1, 1], [], []>} : vector<16x128xf32>, vector<128x128xf32>, vector<16x128xf32> -> vector<16x128xf32>
    %7 = arith.addf %4, %6 : vector<16x128xf32>
    %c0_9 = arith.constant 0 : index
    %c0_10 = arith.constant 0 : index
    %8 = vector.load %arg4[%c0_9, %c0_10] : memref<1x128xf32, #tpu.memory_space<vmem>>, vector<1x128xf32>
    %9 = vector.broadcast %8 : vector<1x128xf32> to vector<16x128xf32>
    %10 = arith.addf %7, %9 : vector<16x128xf32>
    %cst_11 = arith.constant 0.000000e+00 : f32
    %11 = vector.broadcast %cst_11 : f32 to vector<16x128xf32>
    %12 = arith.cmpf ogt, %10, %11 : vector<16x128xf32>
    %cst_12 = arith.constant 0.000000e+00 : f32
    %13 = vector.broadcast %cst_12 : f32 to vector<16x128xf32>
    %14 = arith.minimumf %10, %13 : vector<16x128xf32>
    %15 = math.exp %14 : vector<16x128xf32>
    %cst_13 = arith.constant 1.000000e+00 : f32
    %16 = vector.broadcast %cst_13 : f32 to vector<16x128xf32>
    %17 = arith.subf %15, %16 : vector<16x128xf32>
    %18 = arith.select %12, %10, %17 : vector<16x128xi1>, vector<16x128xf32>
    %c0_14 = arith.constant 0 : index
    %c0_15 = arith.constant 0 : index
    %19 = vector.load %arg7[%c0_14, %c0_15] : memref<128x512xf32, #tpu.memory_space<vmem>>, vector<128x512xf32>
    %cst_16 = arith.constant dense<0.000000e+00> : vector<16x512xf32>
    %20 = tpu.matmul %18, %19, %cst_16 {dimension_numbers = #tpu.dot_dimension_numbers<[1], [0], [0], [1], [0, 0, 1, 1], [], []>} : vector<16x128xf32>, vector<128x512xf32>, vector<16x512xf32> -> vector<16x512xf32>
    %c0_17 = arith.constant 0 : index
    %c0_18 = arith.constant 0 : index
    %21 = vector.load %arg6[%c0_17, %c0_18] : memref<80x16xf32, #tpu.memory_space<vmem>>, vector<80x16xf32>
    %cst_19 = arith.constant dense<0.000000e+00> : vector<80x512xf32>
    %22 = tpu.matmul %21, %20, %cst_19 {dimension_numbers = #tpu.dot_dimension_numbers<[1], [0], [0], [1], [0, 0, 1, 1], [], []>} : vector<80x16xf32>, vector<16x512xf32>, vector<80x512xf32> -> vector<80x512xf32>
    %c0_20 = arith.constant 0 : index
    %c0_21 = arith.constant 0 : index
    %23 = vector.load %arg9[%c0_20, %c0_21] : memref<1x512xf32, #tpu.memory_space<vmem>>, vector<1x512xf32>
    %24 = vector.broadcast %23 : vector<1x512xf32> to vector<80x512xf32>
    %25 = arith.addf %22, %24 : vector<80x512xf32>
    %c0_22 = arith.constant 0 : index
    %c0_23 = arith.constant 0 : index
    %26 = vector.load %arg14[%c0_22, %c0_23] : memref<80x512xf32, #tpu.memory_space<vmem>>, vector<80x512xf32>
    tpu.vector_store %arg14[%c0_22, %c0_23], %25 {strides = array<i32>} : memref<80x512xf32, #tpu.memory_space<vmem>>, vector<80x512xf32>,
    %c0_24 = arith.constant 0 : index
    %c0_25 = arith.constant 0 : index
    %27 = vector.load %arg8[%c0_24, %c0_25] : memref<128x512xf32, #tpu.memory_space<vmem>>, vector<128x512xf32>
    %cst_26 = arith.constant 0.000000e+00 : f32
    %28 = vector.broadcast %cst_26 : f32 to vector<16x128xf32>
    %cst_27 = arith.constant 0.000000e+00 : f32
    %29 = vector.broadcast %cst_27 : f32 to vector<16x128xf32>
    %c0_i32 = arith.constant 0 : i32
    %c16_i32 = arith.constant 16 : i32
    %30 = arith.muli %c0_i32, %c16_i32 : i32
    %31 = tpu.assume_multiple %30, 8 : i32
    %32 = arith.index_cast %31 : i32 to index
    %c0_28 = arith.constant 0 : index
    %33 = vector.load %arg14[%32, %c0_28] : memref<80x512xf32, #tpu.memory_space<vmem>>, vector<16x512xf32>
    %cst_29 = arith.constant dense<0.000000e+00> : vector<16x512xf32>
    %34 = tpu.matmul %28, %27, %cst_29 {dimension_numbers = #tpu.dot_dimension_numbers<[1], [0], [0], [1], [0, 0, 1, 1], [], []>} : vector<16x128xf32>, vector<128x512xf32>, vector<16x512xf32> -> vector<16x512xf32>
    %35 = arith.addf %33, %34 : vector<16x512xf32>
    %36 = vector.extract_strided_slice %35 {offsets = [0, 0], sizes = [16, 128], strides = [1, 1]} : vector<16x512xf32> to vector<16x128xf32>
    %37 = arith.negf %36 : vector<16x128xf32>
    %38 = math.exp %37 : vector<16x128xf32>
    %cst_30 = arith.constant 1.000000e+00 : f32
    %39 = vector.broadcast %cst_30 : f32 to vector<16x128xf32>
    %40 = arith.addf %39, %38 : vector<16x128xf32>
    %41 = arith.divf %39, %40 : vector<16x128xf32>
    %42 = vector.extract_strided_slice %35 {offsets = [0, 128], sizes = [16, 128], strides = [1, 1]} : vector<16x512xf32> to vector<16x128xf32>
    %43 = arith.negf %42 : vector<16x128xf32>
    %44 = math.exp %43 : vector<16x128xf32>
    %cst_31 = arith.constant 1.000000e+00 : f32
    %45 = vector.broadcast %cst_31 : f32 to vector<16x128xf32>
    %46 = arith.addf %45, %44 : vector<16x128xf32>
    %47 = arith.divf %45, %46 : vector<16x128xf32>
    %48 = vector.extract_strided_slice %35 {offsets = [0, 256], sizes = [16, 128], strides = [1, 1]} : vector<16x512xf32> to vector<16x128xf32>
    %49 = math.tanh %48 : vector<16x128xf32>
    %50 = vector.extract_strided_slice %35 {offsets = [0, 384], sizes = [16, 128], strides = [1, 1]} : vector<16x512xf32> to vector<16x128xf32>
    %51 = arith.negf %50 : vector<16x128xf32>
    %52 = math.exp %51 : vector<16x128xf32>
    %cst_32 = arith.constant 1.000000e+00 : f32
    %53 = vector.broadcast %cst_32 : f32 to vector<16x128xf32>
    %54 = arith.addf %53, %52 : vector<16x128xf32>
    %55 = arith.divf %53, %54 : vector<16x128xf32>
    %56 = arith.mulf %47, %29 : vector<16x128xf32>
    %57 = arith.mulf %41, %49 : vector<16x128xf32>
    %58 = arith.addf %56, %57 : vector<16x128xf32>
    %59 = math.tanh %58 : vector<16x128xf32>
    %60 = arith.mulf %55, %59 : vector<16x128xf32>
    %c1_i32 = arith.constant 1 : i32
    %c16_i32_33 = arith.constant 16 : i32
    %61 = arith.muli %c1_i32, %c16_i32_33 : i32
    %62 = tpu.assume_multiple %61, 8 : i32
    %63 = arith.index_cast %62 : i32 to index
    %c0_34 = arith.constant 0 : index
    %64 = vector.load %arg14[%63, %c0_34] : memref<80x512xf32, #tpu.memory_space<vmem>>, vector<16x512xf32>
    %cst_35 = arith.constant dense<0.000000e+00> : vector<16x512xf32>
    %65 = tpu.matmul %60, %27, %cst_35 {dimension_numbers = #tpu.dot_dimension_numbers<[1], [0], [0], [1], [0, 0, 1, 1], [], []>} : vector<16x128xf32>, vector<128x512xf32>, vector<16x512xf32> -> vector<16x512xf32>
    %66 = arith.addf %64, %65 : vector<16x512xf32>
    %67 = vector.extract_strided_slice %66 {offsets = [0, 0], sizes = [16, 128], strides = [1, 1]} : vector<16x512xf32> to vector<16x128xf32>
    %68 = arith.negf %67 : vector<16x128xf32>
    %69 = math.exp %68 : vector<16x128xf32>
    %cst_36 = arith.constant 1.000000e+00 : f32
    %70 = vector.broadcast %cst_36 : f32 to vector<16x128xf32>
    %71 = arith.addf %70, %69 : vector<16x128xf32>
    %72 = arith.divf %70, %71 : vector<16x128xf32>
    %73 = vector.extract_strided_slice %66 {offsets = [0, 128], sizes = [16, 128], strides = [1, 1]} : vector<16x512xf32> to vector<16x128xf32>
    %74 = arith.negf %73 : vector<16x128xf32>
    %75 = math.exp %74 : vector<16x128xf32>
    %cst_37 = arith.constant 1.000000e+00 : f32
    %76 = vector.broadcast %cst_37 : f32 to vector<16x128xf32>
    %77 = arith.addf %76, %75 : vector<16x128xf32>
    %78 = arith.divf %76, %77 : vector<16x128xf32>
    %79 = vector.extract_strided_slice %66 {offsets = [0, 256], sizes = [16, 128], strides = [1, 1]} : vector<16x512xf32> to vector<16x128xf32>
    %80 = math.tanh %79 : vector<16x128xf32>
    %81 = vector.extract_strided_slice %66 {offsets = [0, 384], sizes = [16, 128], strides = [1, 1]} : vector<16x512xf32> to vector<16x128xf32>
    %82 = arith.negf %81 : vector<16x128xf32>
    %83 = math.exp %82 : vector<16x128xf32>
    %cst_38 = arith.constant 1.000000e+00 : f32
    %84 = vector.broadcast %cst_38 : f32 to vector<16x128xf32>
    %85 = arith.addf %84, %83 : vector<16x128xf32>
    %86 = arith.divf %84, %85 : vector<16x128xf32>
    %87 = arith.mulf %78, %58 : vector<16x128xf32>
    %88 = arith.mulf %72, %80 : vector<16x128xf32>
    %89 = arith.addf %87, %88 : vector<16x128xf32>
    %90 = math.tanh %89 : vector<16x128xf32>
    %91 = arith.mulf %86, %90 : vector<16x128xf32>
    %c2_i32 = arith.constant 2 : i32
    %c16_i32_39 = arith.constant 16 : i32
    %92 = arith.muli %c2_i32, %c16_i32_39 : i32
    %93 = tpu.assume_multiple %92, 8 : i32
    %94 = arith.index_cast %93 : i32 to index
    %c0_40 = arith.constant 0 : index
    %95 = vector.load %arg14[%94, %c0_40] : memref<80x512xf32, #tpu.memory_space<vmem>>, vector<16x512xf32>
    %cst_41 = arith.constant dense<0.000000e+00> : vector<16x512xf32>
    %96 = tpu.matmul %91, %27, %cst_41 {dimension_numbers = #tpu.dot_dimension_numbers<[1], [0], [0], [1], [0, 0, 1, 1], [], []>} : vector<16x128xf32>, vector<128x512xf32>, vector<16x512xf32> -> vector<16x512xf32>
    %97 = arith.addf %95, %96 : vector<16x512xf32>
    %98 = vector.extract_strided_slice %97 {offsets = [0, 0], sizes = [16, 128], strides = [1, 1]} : vector<16x512xf32> to vector<16x128xf32>
    %99 = arith.negf %98 : vector<16x128xf32>
    %100 = math.exp %99 : vector<16x128xf32>
    %cst_42 = arith.constant 1.000000e+00 : f32
    %101 = vector.broadcast %cst_42 : f32 to vector<16x128xf32>
    %102 = arith.addf %101, %100 : vector<16x128xf32>
    %103 = arith.divf %101, %102 : vector<16x128xf32>
    %104 = vector.extract_strided_slice %97 {offsets = [0, 128], sizes = [16, 128], strides = [1, 1]} : vector<16x512xf32> to vector<16x128xf32>
    %105 = arith.negf %104 : vector<16x128xf32>
    %106 = math.exp %105 : vector<16x128xf32>
    %cst_43 = arith.constant 1.000000e+00 : f32
    %107 = vector.broadcast %cst_43 : f32 to vector<16x128xf32>
    %108 = arith.addf %107, %106 : vector<16x128xf32>
    %109 = arith.divf %107, %108 : vector<16x128xf32>
    %110 = vector.extract_strided_slice %97 {offsets = [0, 256], sizes = [16, 128], strides = [1, 1]} : vector<16x512xf32> to vector<16x128xf32>
    %111 = math.tanh %110 : vector<16x128xf32>
    %112 = vector.extract_strided_slice %97 {offsets = [0, 384], sizes = [16, 128], strides = [1, 1]} : vector<16x512xf32> to vector<16x128xf32>
    %113 = arith.negf %112 : vector<16x128xf32>
    %114 = math.exp %113 : vector<16x128xf32>
    %cst_44 = arith.constant 1.000000e+00 : f32
    %115 = vector.broadcast %cst_44 : f32 to vector<16x128xf32>
    %116 = arith.addf %115, %114 : vector<16x128xf32>
    %117 = arith.divf %115, %116 : vector<16x128xf32>
    %118 = arith.mulf %109, %89 : vector<16x128xf32>
    %119 = arith.mulf %103, %111 : vector<16x128xf32>
    %120 = arith.addf %118, %119 : vector<16x128xf32>
    %121 = math.tanh %120 : vector<16x128xf32>
    %122 = arith.mulf %117, %121 : vector<16x128xf32>
    %c3_i32 = arith.constant 3 : i32
    %c16_i32_45 = arith.constant 16 : i32
    %123 = arith.muli %c3_i32, %c16_i32_45 : i32
    %124 = tpu.assume_multiple %123, 8 : i32
    %125 = arith.index_cast %124 : i32 to index
    %c0_46 = arith.constant 0 : index
    %126 = vector.load %arg14[%125, %c0_46] : memref<80x512xf32, #tpu.memory_space<vmem>>, vector<16x512xf32>
    %cst_47 = arith.constant dense<0.000000e+00> : vector<16x512xf32>
    %127 = tpu.matmul %122, %27, %cst_47 {dimension_numbers = #tpu.dot_dimension_numbers<[1], [0], [0], [1], [0, 0, 1, 1], [], []>} : vector<16x128xf32>, vector<128x512xf32>, vector<16x512xf32> -> vector<16x512xf32>
    %128 = arith.addf %126, %127 : vector<16x512xf32>
    %129 = vector.extract_strided_slice %128 {offsets = [0, 0], sizes = [16, 128], strides = [1, 1]} : vector<16x512xf32> to vector<16x128xf32>
    %130 = arith.negf %129 : vector<16x128xf32>
    %131 = math.exp %130 : vector<16x128xf32>
    %cst_48 = arith.constant 1.000000e+00 : f32
    %132 = vector.broadcast %cst_48 : f32 to vector<16x128xf32>
    %133 = arith.addf %132, %131 : vector<16x128xf32>
    %134 = arith.divf %132, %133 : vector<16x128xf32>
    %135 = vector.extract_strided_slice %128 {offsets = [0, 128], sizes = [16, 128], strides = [1, 1]} : vector<16x512xf32> to vector<16x128xf32>
    %136 = arith.negf %135 : vector<16x128xf32>
    %137 = math.exp %136 : vector<16x128xf32>
    %cst_49 = arith.constant 1.000000e+00 : f32
    %138 = vector.broadcast %cst_49 : f32 to vector<16x128xf32>
    %139 = arith.addf %138, %137 : vector<16x128xf32>
    %140 = arith.divf %138, %139 : vector<16x128xf32>
    %141 = vector.extract_strided_slice %128 {offsets = [0, 256], sizes = [16, 128], strides = [1, 1]} : vector<16x512xf32> to vector<16x128xf32>
    %142 = math.tanh %141 : vector<16x128xf32>
    %143 = vector.extract_strided_slice %128 {offsets = [0, 384], sizes = [16, 128], strides = [1, 1]} : vector<16x512xf32> to vector<16x128xf32>
    %144 = arith.negf %143 : vector<16x128xf32>
    %145 = math.exp %144 : vector<16x128xf32>
    %cst_50 = arith.constant 1.000000e+00 : f32
    %146 = vector.broadcast %cst_50 : f32 to vector<16x128xf32>
    %147 = arith.addf %146, %145 : vector<16x128xf32>
    %148 = arith.divf %146, %147 : vector<16x128xf32>
    %149 = arith.mulf %140, %120 : vector<16x128xf32>
    %150 = arith.mulf %134, %142 : vector<16x128xf32>
    %151 = arith.addf %149, %150 : vector<16x128xf32>
    %152 = math.tanh %151 : vector<16x128xf32>
    %153 = arith.mulf %148, %152 : vector<16x128xf32>
    %c4_i32 = arith.constant 4 : i32
    %c16_i32_51 = arith.constant 16 : i32
    %154 = arith.muli %c4_i32, %c16_i32_51 : i32
    %155 = tpu.assume_multiple %154, 8 : i32
    %156 = arith.index_cast %155 : i32 to index
    %c0_52 = arith.constant 0 : index
    %157 = vector.load %arg14[%156, %c0_52] : memref<80x512xf32, #tpu.memory_space<vmem>>, vector<16x512xf32>
    %cst_53 = arith.constant dense<0.000000e+00> : vector<16x512xf32>
    %158 = tpu.matmul %153, %27, %cst_53 {dimension_numbers = #tpu.dot_dimension_numbers<[1], [0], [0], [1], [0, 0, 1, 1], [], []>} : vector<16x128xf32>, vector<128x512xf32>, vector<16x512xf32> -> vector<16x512xf32>
    %159 = arith.addf %157, %158 : vector<16x512xf32>
    %160 = vector.extract_strided_slice %159 {offsets = [0, 0], sizes = [16, 128], strides = [1, 1]} : vector<16x512xf32> to vector<16x128xf32>
    %161 = arith.negf %160 : vector<16x128xf32>
    %162 = math.exp %161 : vector<16x128xf32>
    %cst_54 = arith.constant 1.000000e+00 : f32
    %163 = vector.broadcast %cst_54 : f32 to vector<16x128xf32>
    %164 = arith.addf %163, %162 : vector<16x128xf32>
    %165 = arith.divf %163, %164 : vector<16x128xf32>
    %166 = vector.extract_strided_slice %159 {offsets = [0, 128], sizes = [16, 128], strides = [1, 1]} : vector<16x512xf32> to vector<16x128xf32>
    %167 = arith.negf %166 : vector<16x128xf32>
    %168 = math.exp %167 : vector<16x128xf32>
    %cst_55 = arith.constant 1.000000e+00 : f32
    %169 = vector.broadcast %cst_55 : f32 to vector<16x128xf32>
    %170 = arith.addf %169, %168 : vector<16x128xf32>
    %171 = arith.divf %169, %170 : vector<16x128xf32>
    %172 = vector.extract_strided_slice %159 {offsets = [0, 256], sizes = [16, 128], strides = [1, 1]} : vector<16x512xf32> to vector<16x128xf32>
    %173 = math.tanh %172 : vector<16x128xf32>
    %174 = vector.extract_strided_slice %159 {offsets = [0, 384], sizes = [16, 128], strides = [1, 1]} : vector<16x512xf32> to vector<16x128xf32>
    %175 = arith.negf %174 : vector<16x128xf32>
    %176 = math.exp %175 : vector<16x128xf32>
    %cst_56 = arith.constant 1.000000e+00 : f32
    %177 = vector.broadcast %cst_56 : f32 to vector<16x128xf32>
    %178 = arith.addf %177, %176 : vector<16x128xf32>
    %179 = arith.divf %177, %178 : vector<16x128xf32>
    %180 = arith.mulf %171, %151 : vector<16x128xf32>
    %181 = arith.mulf %165, %173 : vector<16x128xf32>
    %182 = arith.addf %180, %181 : vector<16x128xf32>
    %183 = math.tanh %182 : vector<16x128xf32>
    %184 = arith.mulf %179, %183 : vector<16x128xf32>
    %c5_i32 = arith.constant 5 : i32
    %c0_57 = arith.constant 0 : index
    %c0_58 = arith.constant 0 : index
    %185 = vector.load %arg10[%c0_57, %c0_58] : memref<128x128xf32, #tpu.memory_space<vmem>>, vector<128x128xf32>
    %cst_59 = arith.constant dense<0.000000e+00> : vector<16x128xf32>
    %186 = tpu.matmul %184, %185, %cst_59 {dimension_numbers = #tpu.dot_dimension_numbers<[1], [0], [0], [1], [0, 0, 1, 1], [], []>} : vector<16x128xf32>, vector<128x128xf32>, vector<16x128xf32> -> vector<16x128xf32>
    %c0_60 = arith.constant 0 : index
    %c0_61 = arith.constant 0 : index
    %187 = vector.load %arg12[%c0_60, %c0_61] : memref<128x128xf32, #tpu.memory_space<vmem>>, vector<128x128xf32>
    %cst_62 = arith.constant dense<0.000000e+00> : vector<16x128xf32>
    %188 = tpu.matmul %18, %187, %cst_62 {dimension_numbers = #tpu.dot_dimension_numbers<[1], [0], [0], [1], [0, 0, 1, 1], [], []>} : vector<16x128xf32>, vector<128x128xf32>, vector<16x128xf32> -> vector<16x128xf32>
    %189 = arith.addf %186, %188 : vector<16x128xf32>
    %c0_63 = arith.constant 0 : index
    %c0_64 = arith.constant 0 : index
    %190 = vector.load %arg11[%c0_63, %c0_64] : memref<1x128xf32, #tpu.memory_space<vmem>>, vector<1x128xf32>
    %191 = vector.broadcast %190 : vector<1x128xf32> to vector<16x128xf32>
    %192 = arith.addf %189, %191 : vector<16x128xf32>
    %cst_65 = arith.constant dense<0xFF800000> : vector<16xf32>
    %193 = vector.multi_reduction <maximumf>, %192, %cst_65 [1] : vector<16x128xf32> to vector<16xf32>
    %194 = vector.shape_cast %193 : vector<16xf32> to vector<16x1xf32>
    %195 = vector.broadcast %194 : vector<16x1xf32> to vector<16x128xf32>
    %196 = arith.subf %192, %195 : vector<16x128xf32>
    %197 = math.exp %196 : vector<16x128xf32>
    %cst_66 = arith.constant dense<0.000000e+00> : vector<16xf32>
    %198 = vector.multi_reduction <add>, %197, %cst_66 [1] : vector<16x128xf32> to vector<16xf32>
    %199 = vector.shape_cast %198 : vector<16xf32> to vector<16x1xf32>
    %200 = math.log %199 : vector<16x1xf32>
    %201 = vector.broadcast %200 : vector<16x1xf32> to vector<16x128xf32>
    %202 = arith.subf %196, %201 : vector<16x128xf32>
    %c0_67 = arith.constant 0 : index
    %c0_68 = arith.constant 0 : index
    %203 = vector.load %arg13[%c0_67, %c0_68] : memref<16x128xf32, #tpu.memory_space<vmem>>, vector<16x128xf32>
    tpu.vector_store %arg13[%c0_67, %c0_68], %202 {strides = array<i32>} : memref<16x128xf32, #tpu.memory_space<vmem>>, vector<16x128xf32>,
    return
  }
  func.func @transform_0(%arg0: i32) -> (i32, i32) {
    %c0_i32 = arith.constant 0 : i32
    %c0_i32_0 = arith.constant 0 : i32
    %c0_i32_1 = arith.constant 0 : i32
    return %c0_i32, %c0_i32_0 : i32, i32
  }
  func.func @transform_1(%arg0: i32) -> (i32, i32) {
    %c0_i32 = arith.constant 0 : i32
    %c0_i32_0 = arith.constant 0 : i32
    %c0_i32_1 = arith.constant 0 : i32
    return %c0_i32, %c0_i32_0 : i32, i32
  }
  func.func @transform_2(%arg0: i32) -> (i32, i32) {
    %c0_i32 = arith.constant 0 : i32
    %c0_i32_0 = arith.constant 0 : i32
    %c0_i32_1 = arith.constant 0 : i32
    return %c0_i32, %c0_i32_0 : i32, i32
  }
  func.func @transform_3(%arg0: i32) -> (i32, i32) {
    %c0_i32 = arith.constant 0 : i32
    %c0_i32_0 = arith.constant 0 : i32
    %c0_i32_1 = arith.constant 0 : i32
    return %c0_i32, %c0_i32_0 : i32, i32
  }
  func.func @transform_4(%arg0: i32) -> (i32, i32) {
    %c0_i32 = arith.constant 0 : i32
    %c0_i32_0 = arith.constant 0 : i32
    %c0_i32_1 = arith.constant 0 : i32
    return %c0_i32, %c0_i32_0 : i32, i32
  }
  func.func @transform_5(%arg0: i32) -> (i32, i32) {
    %c0_i32 = arith.constant 0 : i32
    %c0_i32_0 = arith.constant 0 : i32
    %c0_i32_1 = arith.constant 0 : i32
    return %c0_i32, %c0_i32_0 : i32, i32
  }
  func.func @transform_6(%arg0: i32) -> (i32, i32) {
    %c0_i32 = arith.constant 0 : i32
    %c0_i32_0 = arith.constant 0 : i32
    %c0_i32_1 = arith.constant 0 : i32
    return %c0_i32, %c0_i32_0 : i32, i32
  }
  func.func @transform_7(%arg0: i32) -> (i32, i32) {
    %c0_i32 = arith.constant 0 : i32
    %c0_i32_0 = arith.constant 0 : i32
    %c0_i32_1 = arith.constant 0 : i32
    return %c0_i32, %c0_i32_0 : i32, i32
  }
  func.func @transform_8(%arg0: i32) -> (i32, i32) {
    %c0_i32 = arith.constant 0 : i32
    %c0_i32_0 = arith.constant 0 : i32
    %c0_i32_1 = arith.constant 0 : i32
    return %c0_i32, %c0_i32_0 : i32, i32
  }
  func.func @transform_9(%arg0: i32) -> (i32, i32) {
    %c0_i32 = arith.constant 0 : i32
    %c0_i32_0 = arith.constant 0 : i32
    %c0_i32_1 = arith.constant 0 : i32
    return %c0_i32, %c0_i32_0 : i32, i32
  }
  func.func @transform_10(%arg0: i32) -> (i32, i32) {
    %c0_i32 = arith.constant 0 : i32
    %c0_i32_0 = arith.constant 0 : i32
    %c0_i32_1 = arith.constant 0 : i32
    return %c0_i32, %c0_i32_0 : i32, i32
  }
  func.func @transform_11(%arg0: i32) -> (i32, i32) {
    %c0_i32 = arith.constant 0 : i32
    %c0_i32_0 = arith.constant 0 : i32
    %c0_i32_1 = arith.constant 0 : i32
    return %c0_i32, %c0_i32_0 : i32, i32
  }
  func.func @transform_12(%arg0: i32) -> (i32, i32) {
    %c0_i32 = arith.constant 0 : i32
    %c0_i32_0 = arith.constant 0 : i32
    %c0_i32_1 = arith.constant 0 : i32
    return %c0_i32, %c0_i32_0 : i32, i32
  }
}

</mosaic_0001>

<bundles_post_ra>
// kernel: fwd.1
= control target key start
LH: loop header
LB: loop body
LE: loop exit
PB: predicated region body
PF: predicated region fallthrough
CT: control target
= control target key end

     0   :  { %17 = vsyncpa [#allocation4], 0  ;;  %s3937_s0 = inlined_call_operand.vmem [shape: f32[16,16], index: 0, kind: input, shape index: {}]   ;;  %s3938_s1 = inlined_call_operand.vmem [shape: f32[16,128], index: 1, kind: input, shape index: {}]   ;;  %s3939_s2 = inlined_call_operand.hbm [shape: f32[128,128], index: 2, kind: input, shape index: {}]   ;;  %s3940_s3 = inlined_call_operand.vmem [shape: f32[1,128], index: 3, kind: input, shape index: {}]   ;;  %s3941_s4 = inlined_call_operand.hbm [shape: f32[128,128], index: 4, kind: input, shape index: {}]   ;;  %s3942_s5 = inlined_call_operand.vmem [shape: f32[80,16], index: 5, kind: input, shape index: {}]   ;;  %s3943_s6 = inlined_call_operand.hbm [shape: f32[128,512], index: 6, kind: input, shape index: {}]   ;;  %s3944_s7 = inlined_call_operand.hbm [shape: f32[128,512], index: 7, kind: input, shape index: {}]   ;;  %s3945_s8 = inlined_call_operand.vmem [shape: f32[1,512], index: 8, kind: input, shape index: {}]   ;;  %s3946_s9 = inlined_call_operand.hbm [shape: f32[128,128], index: 9, kind: input, shape index: {}]   ;;  %s3947_s10 = inlined_call_operand.vmem [shape: f32[1,128], index: 10, kind: input, shape index: {}]   ;;  %s3948_s11 = inlined_call_operand.hbm [shape: f32[128,128], index: 11, kind: input, shape index: {}]   ;;  %s3949_s12 = inlined_call_operand.vmem [shape: f32[16,128], index: 12, kind: output, shape index: {}]  }
   0x1   :  { %18 = vsyncpa [#allocation6], 0 }
   0x2   :  { %19 = vsyncpa [#allocation9], 0 }
   0x3   :  { %20 = vsyncpa [#allocation12], 0  ;;  %s3030_s21 = smov [#allocation5]  }
   0x4   :  { %s44_s22 = sshll.u32 %s3030_s21, 4  ;;  %s45_s22 = int_to_ptr.vmem [resolvable:$true] %s44_s22 }
   0x5   :  { %s2910_s23 = scalar_lea.vmem %s45_s22, 2048  ;;  %p2915_p1 = scmp.lt.s32.totalorder %s45_s22, %s45_s22 }
   0x6   :  { %p2911_p0 = scmp.ne.s32.totalorder %s45_s22, %s2910_s23  ;;  %p2916_p2 = scmp.lt.s32.totalorder %s2910_s23, %s2910_s23 }
   0x8   :  { %p2917_p3 = por %p2916_p2, %p2915_p1 }
   0xa   :  { %p2918_p4 = pnand %p2917_p3, %p2911_p0 }
   0xc   :  { %2921 = shalt.err (!%p2918_p4)
}
   0xd   :  { %s3031_s24 = smov 128   ;;  %s3032_s25 = smov 8  }
   0xe   :  { %50 = dma.hbm_to_vmem [thread:$0]  %s3941_s4, 2048, %s45_s22, [#allocation6], %s3031_s24, %s3031_s24, %s3032_s25  }
   0xf   :  { %s3033_s28 = smov [#allocation8]   ;;  %s3034_s30 = smov [#allocation3]  }
  0x10   :  { %s70_s29 = sshll.u32 %s3033_s28, 4  ;;  %s30_s13 = sshll.u32 %s3034_s30, 4  ;;  %s71_s29 = int_to_ptr.vmem [resolvable:$true] %s70_s29  ;;  %s31_s13 = int_to_ptr.vmem [resolvable:$true] %s30_s13 }
  0x11   :  { %s2930_s14 = scalar_lea.vmem %s71_s29, 8192  ;;  %p2935_p6 = scmp.lt.s32.totalorder %s71_s29, %s71_s29 }
  0x12   :  { %p2931_p5 = scmp.ne.s32.totalorder %s71_s29, %s2930_s14  ;;  %p2936_p7 = scmp.lt.s32.totalorder %s2930_s14, %s2930_s14 }
  0x14   :  { %p2937_p8 = por %p2936_p7, %p2935_p6 }
  0x16   :  { %p2938_p9 = pnand %p2937_p8, %p2931_p5 }
  0x18   :  { %2941 = shalt.err (!%p2938_p9)
}
  0x19   :  { %s3035_s15 = smov 512   ;;  %s3036_s16 = smov 32  }
  0x1a   :  { %76 = dma.hbm_to_vmem [thread:$0]  %s3944_s7, 8192, %s71_s29, [#allocation9], %s3035_s15, %s3035_s15, %s3036_s16  }
  0x1b   :  { %s2950_s4 = scalar_lea.vmem %s31_s13, 2048  ;;  %p2955_p11 = scmp.lt.s32.totalorder %s31_s13, %s31_s13 }
  0x1c   :  { %p2951_p10 = scmp.ne.s32.totalorder %s31_s13, %s2950_s4  ;;  %p2956_p12 = scmp.lt.s32.totalorder %s2950_s4, %s2950_s4 }
  0x1e   :  { %p2957_p13 = por %p2956_p12, %p2955_p11 }
  0x20   :  { %p2958_p0 = pnand %p2957_p13, %p2951_p10 }
  0x22   :  { %2961 = shalt.err (!%p2958_p0)
}
  0x23   :  { %36 = dma.hbm_to_vmem [thread:$0]  %s3939_s2, 2048, %s31_s13, [#allocation4], %s3031_s24, %s3031_s24, %s3032_s25  }
  0x24   :  { %s3037_s21 = smov [#allocation7]   ;;  %s3038_s23 = smov [#allocation10]  }
  0x25   :  { %s58_s22 = sshll.u32 %s3037_s21, 4  ;;  %s84_s7 = sshll.u32 %s3038_s23, 4  ;;  %s59_s22 = int_to_ptr.vmem [resolvable:$true] %s58_s22  ;;  %s85_s7 = int_to_ptr.vmem [resolvable:$true] %s84_s7 }
  0x26   :  { %s2970_s26 = scalar_lea.vmem %s59_s22, 8192  ;;  %p2975_p2 = scmp.lt.s32.totalorder %s59_s22, %s59_s22 }
  0x27   :  { %p2971_p1 = scmp.ne.s32.totalorder %s59_s22, %s2970_s26  ;;  %p2976_p3 = scmp.lt.s32.totalorder %s2970_s26, %s2970_s26 }
  0x29   :  { %p2977_p4 = por %p2976_p3, %p2975_p2 }
  0x2b   :  { %p2978_p5 = pnand %p2977_p4, %p2971_p1 }
  0x2d   :  { %2981 = shalt.err (!%p2978_p5)
}
  0x2e   :  { %64 = dma.hbm_to_vmem [thread:$0]  %s3943_s6, 8192, %s59_s22, [#allocation6], %s3035_s15, %s3035_s15, %s3036_s16  }
  0x2f   :  { %s2990_s29 = scalar_lea.vmem %s85_s7, 2048  ;;  %p2995_p7 = scmp.lt.s32.totalorder %s85_s7, %s85_s7 }
  0x30   :  { %p2991_p6 = scmp.ne.s32.totalorder %s85_s7, %s2990_s29  ;;  %p2996_p8 = scmp.lt.s32.totalorder %s2990_s29, %s2990_s29 }
  0x32   :  { %p2997_p9 = por %p2996_p8, %p2995_p7 }
  0x34   :  { %p2998_p10 = pnand %p2997_p9, %p2991_p6 }
  0x36   :  { %3001 = shalt.err (!%p2998_p10)
}
  0x37   :  { %90 = dma.hbm_to_vmem [thread:$0]  %s3946_s9, 2048, %s85_s7, [#allocation9], %s3031_s24, %s3031_s24, %s3032_s25  }
  0x38   :  { %s3039_s13 = smov [#allocation11]  }
  0x39   :  { %s98_s14 = sshll.u32 %s3039_s13, 4  ;;  %s99_s14 = int_to_ptr.vmem [resolvable:$true] %s98_s14 }
  0x3a   :  { %s3010_s17 = scalar_lea.vmem %s99_s14, 2048  ;;  %p3015_p12 = scmp.lt.s32.totalorder %s99_s14, %s99_s14 }
  0x3b   :  { %p3011_p11 = scmp.ne.s32.totalorder %s99_s14, %s3010_s17  ;;  %p3016_p13 = scmp.lt.s32.totalorder %s3010_s17, %s3010_s17 }
  0x3d   :  { %p3017_p0 = por %p3016_p13, %p3015_p12 }
  0x3f   :  { %p3018_p1 = pnand %p3017_p0, %p3011_p11 }
  0x41   :  { %3021 = shalt.err (!%p3018_p1)
}
  0x42   :  { %104 = dma.hbm_to_vmem [thread:$0]  %s3948_s11, 2048, %s99_s14, [#allocation12], %s3031_s24, %s3031_s24, %s3032_s25  }
  0x43   :  { %3022 = dma.done.wait [#allocation4], 2048  }
  0x44   :  { %3023 = vsyncadd [#allocation4], 4294965248 }
  0x45   :  { %3024 = dma.done.wait [#allocation6], 10240  }
  0x46   :  { %3025 = vsyncadd [#allocation6], 4294957056 }
  0x47   :  { %3026 = dma.done.wait [#allocation9], 10240  }
  0x48   :  { %3027 = vsyncadd [#allocation9], 4294957056 }
  0x49   :  { %3028 = dma.done.wait [#allocation12], 2048  }
  0x4a   :  { %3029 = vsyncadd [#allocation12], 4294965248  ;;  %vm127_vm0 = vcmask 130048   ;;  %v3139_v0 = vld [vmem:[%s3938_s1 + $0x8] sm:$0xff]  ;;  %v3144_v1 = vld [vmem:[%s3938_s1] sm:$0xff] }
  0x4b   :  { %v125_v2 = vld [vmem:[%s3937_s0] sm:$0xff]  ;;  %2508 = vmatprep.subr.mxu0 %v3139_v0  ;;  %v240_v3 = vld [vmem:[#allocation5 + $0x78] sm:$0xff]  ;;  %v239_v4 = vld [vmem:[#allocation5 + $0x70] sm:$0xff]  ;;  %2547 = vmatprep.mubr.f32.mxu1 %v3144_v1 }
  0x4c   :  { %2512 = vmatprep.mubr.msk.f32.mxu0 %vm127_vm0, %v125_v2  ;;  %2509 = vmatpush3.msra.mxu0 %v3139_v0  ;;  %v126_v5 = vld [vmem:[%s3937_s0 + $0x8] sm:$0xff]  ;;  %v224_v6 = vld [vmem:[#allocation3 + $0x78] sm:$0xff]  ;;  %v223_v8 = vld [vmem:[#allocation3 + $0x70] sm:$0xff] }
  0x4d   :  { %2515 = vmatprep.subr.mxu1 %v240_v3  ;;  %2510 = vmatprep.subr.mxu0 %v3144_v1  ;;  %v238_v7 = vld [vmem:[#allocation5 + $0x68] sm:$0xff]  ;;  %v237_v9 = vld [vmem:[#allocation5 + $0x60] sm:$0xff]  ;;  %v236_v11 = vld [vmem:[#allocation5 + $0x58] sm:$0xff] }
  0x4e   :  { %2516 = vmatpush3.msra.mxu1 %v240_v3  ;;  %2511 = vmatpush3.msra.mxu0 %v3144_v1  ;;  %v222_v10 = vld [vmem:[#allocation3 + $0x68] sm:$0xff]  ;;  %v221_v12 = vld [vmem:[#allocation3 + $0x60] sm:$0xff]  ;;  %v235_v13 = vld [vmem:[#allocation5 + $0x50] sm:$0xff] }
  0x4f   :  { %2517 = vmatprep.subr.mxu1 %v239_v4  ;;  %2513 = vmatmul.mubr.msk.f32.vlgmr.msra.gmra.mxu0 %vm127_vm0, %v126_v5  ;;  %v220_v14 = vld [vmem:[#allocation3 + $0x58] sm:$0xff]  ;;  %v234_v15 = vld [vmem:[#allocation5 + $0x48] sm:$0xff]  ;;  %v219_v16 = vld [vmem:[#allocation3 + $0x50] sm:$0xff] }
  0x50   :  { %2550 = vmatprep.subr.mxu0 %v224_v6  ;;  %2518 = vmatpush3.msra.mxu1 %v239_v4  ;;  %v233_v17 = vld [vmem:[#allocation5 + $0x40] sm:$0xff]  ;;  %v218_v18 = vld [vmem:[#allocation3 + $0x48] sm:$0xff]  ;;  %v232_v19 = vld [vmem:[#allocation5 + $0x38] sm:$0xff] }
  0x51   :  { %2551 = vmatpush3.msra.mxu0 %v224_v6  ;;  %2519 = vmatprep.subr.mxu1 %v238_v7  ;;  %v217_v20 = vld [vmem:[#allocation3 + $0x40] sm:$0xff]  ;;  %v231_v21 = vld [vmem:[#allocation5 + $0x30] sm:$0xff]  ;;  %v216_v22 = vld [vmem:[#allocation3 + $0x38] sm:$0xff] }
  0x52   :  { %2552 = vmatprep.subr.mxu0 %v223_v8  ;;  %2520 = vmatpush3.msra.mxu1 %v238_v7  ;;  %v230_v23 = vld [vmem:[#allocation5 + $0x28] sm:$0xff]  ;;  %v215_v24 = vld [vmem:[#allocation3 + $0x30] sm:$0xff]  ;;  %v229_v25 = vld [vmem:[#allocation5 + $0x20] sm:$0xff] }
  0x53   :  { %2553 = vmatpush3.msra.mxu0 %v223_v8  ;;  %2521 = vmatprep.subr.mxu1 %v237_v9  ;;  %v214_v26 = vld [vmem:[#allocation3 + $0x28] sm:$0xff]  ;;  %v228_v27 = vld [vmem:[#allocation5 + $0x18] sm:$0xff]  ;;  %v213_v28 = vld [vmem:[#allocation3 + $0x20] sm:$0xff] }
  0x54   :  { %2554 = vmatprep.subr.mxu0 %v222_v10  ;;  %2522 = vmatpush3.msra.mxu1 %v237_v9  ;;  %v227_v29 = vld [vmem:[#allocation5 + $0x10] sm:$0xff]  ;;  %v212_v30 = vld [vmem:[#allocation3 + $0x18] sm:$0xff]  ;;  %v226_v31 = vld [vmem:[#allocation5 + $0x8] sm:$0xff] }
  0x55   :  { %2555 = vmatpush3.msra.mxu0 %v222_v10  ;;  %2523 = vmatprep.subr.mxu1 %v236_v11  ;;  %v211_v32 = vld [vmem:[#allocation3 + $0x10] sm:$0xff]  ;;  %v225_v33 = vld [vmem:[#allocation5] sm:$0xff]  ;;  %v210_v34 = vld [vmem:[#allocation3 + $0x8] sm:$0xff] }
  0x56   :  { %2556 = vmatprep.subr.mxu0 %v221_v12  ;;  %2524 = vmatpush3.msra.mxu1 %v236_v11  ;;  %v209_v35 = vld [vmem:[#allocation3] sm:$0xff]  ;;  %v473_v36 = vld [vmem:[#allocation7 + $0x1e8] sm:$0xff]  ;;  %v475_v37 = vld [vmem:[#allocation7 + $0x1f8] sm:$0xff] }
  0x57   :  { %2557 = vmatpush3.msra.mxu0 %v221_v12  ;;  %2525 = vmatprep.subr.mxu1 %v235_v13  ;;  %v472_v38 = vld [vmem:[#allocation7 + $0x1e0] sm:$0xff]  ;;  %v469_v39 = vld [vmem:[#allocation7 + $0x1c8] sm:$0xff]  ;;  %v474_v43 = vld [vmem:[#allocation7 + $0x1f0] sm:$0xff] }
  0x58   :  { %2558 = vmatprep.subr.mxu0 %v220_v14  ;;  %2526 = vmatpush3.msra.mxu1 %v235_v13  ;;  %v468_v40 = vld [vmem:[#allocation7 + $0x1c0] sm:$0xff]  ;;  %v471_v44 = vld [vmem:[#allocation7 + $0x1d8] sm:$0xff]  ;;  %v470_v45 = vld [vmem:[#allocation7 + $0x1d0] sm:$0xff] }
  0x59   :  { %2559 = vmatpush3.msra.mxu0 %v220_v14  ;;  %2527 = vmatprep.subr.mxu1 %v234_v15  ;;  %v465_v46 = vld [vmem:[#allocation7 + $0x1a8] sm:$0xff]  ;;  %v467_v47 = vld [vmem:[#allocation7 + $0x1b8] sm:$0xff]  ;;  %v464_v48 = vld [vmem:[#allocation7 + $0x1a0] sm:$0xff] }
  0x5a   :  { %2560 = vmatprep.subr.mxu0 %v219_v16  ;;  %2528 = vmatpush3.msra.mxu1 %v234_v15  ;;  %v466_v49 = vld [vmem:[#allocation7 + $0x1b0] sm:$0xff]  ;;  %v461_v50 = vld [vmem:[#allocation7 + $0x188] sm:$0xff]  ;;  %v463_v51 = vld [vmem:[#allocation7 + $0x198] sm:$0xff] }
  0x5b   :  { %2561 = vmatpush3.msra.mxu0 %v219_v16  ;;  %2529 = vmatprep.subr.mxu1 %v233_v17  ;;  %v460_v52 = vld [vmem:[#allocation7 + $0x180] sm:$0xff]  ;;  %v462_v53 = vld [vmem:[#allocation7 + $0x190] sm:$0xff]  ;;  %v457_v54 = vld [vmem:[#allocation7 + $0x168] sm:$0xff] }
  0x5c   :  { %2562 = vmatprep.subr.mxu0 %v218_v18  ;;  %2530 = vmatpush3.msra.mxu1 %v233_v17  ;;  %v459_v55 = vld [vmem:[#allocation7 + $0x178] sm:$0xff]  ;;  %v456_v56 = vld [vmem:[#allocation7 + $0x160] sm:$0xff]  ;;  %v458_v57 = vld [vmem:[#allocation7 + $0x170] sm:$0xff] }
  0x5d   :  { %2563 = vmatpush3.msra.mxu0 %v218_v18  ;;  %2531 = vmatprep.subr.mxu1 %v232_v19  ;;  %v453_v58 = vld [vmem:[#allocation7 + $0x148] sm:$0xff]  ;;  %v455_v59 = vld [vmem:[#allocation7 + $0x158] sm:$0xff]  ;;  %v452_v60 = vld [vmem:[#allocation7 + $0x140] sm:$0xff] }
  0x5e   :  { %2564 = vmatprep.subr.mxu0 %v217_v20  ;;  %2532 = vmatpush3.msra.mxu1 %v232_v19  ;;  %v454_v61 = vld [vmem:[#allocation7 + $0x150] sm:$0xff]  ;;  %v449_v62 = vld [vmem:[#allocation7 + $0x128] sm:$0xff]  ;;  %v451_v63 = vld [vmem:[#allocation7 + $0x138] sm:$0xff] }
  0x5f   :  { %2565 = vmatpush3.msra.mxu0 %v217_v20  ;;  %2533 = vmatprep.subr.mxu1 %v231_v21  ;;  %v450_v1 = vld [vmem:[#allocation7 + $0x130] sm:$0xff]  ;;  %v445_v2 = vld [vmem:[#allocation7 + $0x108] sm:$0xff]  ;;  %v447_v3 = vld [vmem:[#allocation7 + $0x118] sm:$0xff] }
  0x60   :  { %2566 = vmatprep.subr.mxu0 %v216_v22  ;;  %2534 = vmatpush3.msra.mxu1 %v231_v21  ;;  %v444_v4 = vld [vmem:[#allocation7 + $0x100] sm:$0xff]  ;;  %v446_v5 = vld [vmem:[#allocation7 + $0x110] sm:$0xff]  ;;  %v441_v6 = vld [vmem:[#allocation7 + $0xe8] sm:$0xff] }
  0x61   :  { %2567 = vmatpush3.msra.mxu0 %v216_v22  ;;  %2535 = vmatprep.subr.mxu1 %v230_v23  ;;  %v443_v7 = vld [vmem:[#allocation7 + $0xf8] sm:$0xff]  ;;  %v440_v8 = vld [vmem:[#allocation7 + $0xe0] sm:$0xff]  ;;  %v442_v9 = vld [vmem:[#allocation7 + $0xf0] sm:$0xff] }
  0x62   :  { %2568 = vmatprep.subr.mxu0 %v215_v24  ;;  %2536 = vmatpush3.msra.mxu1 %v230_v23  ;;  %v437_v10 = vld [vmem:[#allocation7 + $0xc8] sm:$0xff]  ;;  %v439_v11 = vld [vmem:[#allocation7 + $0xd8] sm:$0xff]  ;;  %v436_v12 = vld [vmem:[#allocation7 + $0xc0] sm:$0xff] }
  0x63   :  { %2569 = vmatpush3.msra.mxu0 %v215_v24  ;;  %2537 = vmatprep.subr.mxu1 %v229_v25  ;;  %v438_v13 = vld [vmem:[#allocation7 + $0xd0] sm:$0xff]  ;;  %v433_v14 = vld [vmem:[#allocation7 + $0xa8] sm:$0xff]  ;;  %v435_v15 = vld [vmem:[#allocation7 + $0xb8] sm:$0xff] }
  0x64   :  { %2570 = vmatprep.subr.mxu0 %v214_v26  ;;  %2538 = vmatpush3.msra.mxu1 %v229_v25  ;;  %v432_v16 = vld [vmem:[#allocation7 + $0xa0] sm:$0xff]  ;;  %v434_v17 = vld [vmem:[#allocation7 + $0xb0] sm:$0xff]  ;;  %v429_v18 = vld [vmem:[#allocation7 + $0x88] sm:$0xff] }
  0x65   :  { %2571 = vmatpush3.msra.mxu0 %v214_v26  ;;  %2539 = vmatprep.subr.mxu1 %v228_v27  ;;  %v431_v19 = vld [vmem:[#allocation7 + $0x98] sm:$0xff]  ;;  %v428_v20 = vld [vmem:[#allocation7 + $0x80] sm:$0xff]  ;;  %v430_v21 = vld [vmem:[#allocation7 + $0x90] sm:$0xff] }
  0x66   :  { %2572 = vmatprep.subr.mxu0 %v213_v28  ;;  %2540 = vmatpush3.msra.mxu1 %v228_v27  ;;  %v425_v22 = vld [vmem:[#allocation7 + $0x68] sm:$0xff]  ;;  %v427_v23 = vld [vmem:[#allocation7 + $0x78] sm:$0xff]  ;;  %v424_v24 = vld [vmem:[#allocation7 + $0x60] sm:$0xff] }
  0x67   :  { %2573 = vmatpush3.msra.mxu0 %v213_v28  ;;  %2541 = vmatprep.subr.mxu1 %v227_v29  ;;  %v426_v25 = vld [vmem:[#allocation7 + $0x70] sm:$0xff]  ;;  %v421_v26 = vld [vmem:[#allocation7 + $0x48] sm:$0xff]  ;;  %v423_v27 = vld [vmem:[#allocation7 + $0x58] sm:$0xff] }
  0x68   :  { %2574 = vmatprep.subr.mxu0 %v212_v30  ;;  %2542 = vmatpush3.msra.mxu1 %v227_v29  ;;  %v420_v28 = vld [vmem:[#allocation7 + $0x40] sm:$0xff]  ;;  %v422_v29 = vld [vmem:[#allocation7 + $0x50] sm:$0xff] }
  0x69   :  { %2575 = vmatpush3.msra.mxu0 %v212_v30  ;;  %2543 = vmatprep.subr.mxu1 %v226_v31  ;;  %v417_v30 = vld [vmem:[#allocation7 + $0x28] sm:$0xff] }
  0x6a   :  { %2576 = vmatprep.subr.mxu0 %v211_v32  ;;  %2544 = vmatpush3.msra.mxu1 %v226_v31  ;;  %v419_v31 = vld [vmem:[#allocation7 + $0x38] sm:$0xff] }
  0x6b   :  { %2577 = vmatpush3.msra.mxu0 %v211_v32  ;;  %2545 = vmatprep.subr.mxu1 %v225_v33  ;;  %v416_v32 = vld [vmem:[#allocation7 + $0x20] sm:$0xff] }
  0x6c   :  { %2578 = vmatprep.subr.mxu0 %v210_v34  ;;  %2546 = vmatpush3.msra.mxu1 %v225_v33  ;;  %v418_v33 = vld [vmem:[#allocation7 + $0x30] sm:$0xff] }
  0x6d   :  { %2579 = vmatpush3.msra.mxu0 %v210_v34  ;;  %2548 = vmatmul.mubr.f32.vlgmr.msra.gmra.mxu1 %v3139_v0  ;;  %v448_v0 = vld [vmem:[#allocation7 + $0x120] sm:$0xff]  ;;  %v413_v34 = vld [vmem:[#allocation7 + $0x8] sm:$0xff] }
  0x6e   :  { %2580 = vmatprep.subr.mxu0 %v209_v35  ;;  %476 = vmatprep.subr.mxu1 %v473_v36  ;;  %v412_v36 = vld [vmem:[#allocation7] sm:$0xff] }
  0x6f   :  { %2581 = vmatpush3.msra.mxu0 %v209_v35  ;;  %477 = vmatpush1.msra.mxu1 %v472_v38  ;;  %v415_v35 = vld [vmem:[#allocation7 + $0x18] sm:$0xff]  ;;  %v3952_v38 = vmov 0.0  }
  0x70   :  { %553 = vmatprep.subr.mxu0 %v475_v37  ;;  %478 = vmatprep.subr.mxu1 %v469_v39  ;;  %v414_v37 = vld [vmem:[#allocation7 + $0x10] sm:$0xff] }
  0x71   :  { %479 = vmatpush1.msra.mxu1 %v468_v40  ;;  %540 = vmatprep.mubr.f32.mxu1 %v3952_v38 }
  0x72   :  { %480 = vmatprep.subr.mxu1 %v465_v46 }
  0x73   :  { %481 = vmatpush1.msra.mxu1 %v464_v48 }
  0x74   :  { %482 = vmatprep.subr.mxu1 %v461_v50 }
  0x75   :  { %483 = vmatpush1.msra.mxu1 %v460_v52 }
  0x76   :  { %484 = vmatprep.subr.mxu1 %v457_v54 }
  0x77   :  { %485 = vmatpush1.msra.mxu1 %v456_v56 }
  0x78   :  { %486 = vmatprep.subr.mxu1 %v453_v58 }
  0x79   :  { %487 = vmatpush1.msra.mxu1 %v452_v60 }
  0x7a   :  { %488 = vmatprep.subr.mxu1 %v449_v62 }
  0x7b   :  { %489 = vmatpush1.msra.mxu1 %v448_v0 }
  0x7c   :  { %490 = vmatprep.subr.mxu1 %v445_v2  ;;  %v630_v2 = vld [vmem:[%s3942_s5] sm:$0xff] }
  0x7d   :  { %491 = vmatpush1.msra.mxu1 %v444_v4  ;;  %v3182_v4 = vld [vmem:[#allocation8 + $0x1f8] sm:$0xff] }
  0x7e   :  { %492 = vmatprep.subr.mxu1 %v441_v6  ;;  %4011 = vst [vmem:[#allocation20_spill] sm:$0xff] %v3182_v4  ;;  %v3188_v6 = vld [vmem:[#allocation8 + $0x1f0] sm:$0xff] }
  0x7f   :  { %493 = vmatpush1.msra.mxu1 %v440_v8  ;;  %v3198_v8 = vld [vmem:[#allocation8 + $0x1c8] sm:$0xff] }
  0x80   :  { %494 = vmatprep.subr.mxu1 %v437_v10  ;;  %v3205_v10 = vld [vmem:[#allocation8 + $0x1c0] sm:$0xff] }
  0x81   :  { %495 = vmatpush1.msra.mxu1 %v436_v12  ;;  %v632_v12 = vld [vmem:[%s3942_s5 + $0x10] sm:$0xff] }
  0x82   :  { %496 = vmatprep.subr.mxu1 %v433_v14  ;;  %v3219_v14 = vld [vmem:[#allocation8 + $0x1a0] sm:$0xff] }
  0x83   :  { %497 = vmatpush1.msra.mxu1 %v432_v16  ;;  %v3226_v16 = vld [vmem:[#allocation8 + $0x1b8] sm:$0xff] }
  0x84   :  { %498 = vmatprep.subr.mxu1 %v429_v18  ;;  %v3235_v18 = vld [vmem:[#allocation8 + $0x180] sm:$0xff] }
  0x85   :  { %499 = vmatpush1.msra.mxu1 %v428_v20  ;;  %v3241_v20 = vld [vmem:[#allocation8 + $0x168] sm:$0xff] }
  0x86   :  { %500 = vmatprep.subr.mxu1 %v425_v22  ;;  %v3249_v22 = vld [vmem:[#allocation8 + $0x160] sm:$0xff] }
  0x87   :  { %501 = vmatpush1.msra.mxu1 %v424_v24  ;;  %v634_v24 = vld [vmem:[%s3942_s5 + $0x20] sm:$0xff] }
  0x88   :  { %502 = vmatprep.subr.mxu1 %v421_v26  ;;  %v3262_v26 = vld [vmem:[#allocation8 + $0x148] sm:$0xff] }
  0x89   :  { %503 = vmatpush1.msra.mxu1 %v420_v28  ;;  %v3268_v28 = vld [vmem:[#allocation8 + $0x140] sm:$0xff] }
  0x8a   :  { %504 = vmatprep.subr.mxu1 %v417_v30  ;;  %v3276_v30 = vld [vmem:[#allocation8 + $0x128] sm:$0xff] }
  0x8b   :  { %505 = vmatpush1.msra.mxu1 %v416_v32  ;;  %v635_v32 = vld [vmem:[%s3942_s5 + $0x28] sm:$0xff] }
  0x8c   :  { %506 = vmatprep.subr.mxu1 %v413_v34  ;;  %v3291_v34 = vld [vmem:[#allocation8 + $0x138] sm:$0xff] }
  0x8d   :  { %507 = vmatpush1.msra.mxu1 %v412_v36  ;;  %v3297_v36 = vld [vmem:[#allocation8 + $0x130] sm:$0xff] }
 0x10f   :  { %v2514_v41 = vpop.f32.mrf.mxu0 }
 0x111   :  { %v200_v42 = vpop.f32.mrf.mxu0 }
 0x112   :  { %2582 = vmatprep.mubr.f32.mxu0 %v200_v42 }
 0x113   :  { %2583 = vmatmul.mubr.f32.vlgmr.msra.gmra.mxu0 %v2514_v41  ;;  %v2378_v41 = vld [vmem:[%s3940_s3] ss:$0 sm:$0xff] }
 0x114   :  { %554 = vmatpush1.msra.mxu0 %v474_v43  ;;  %617 = vmatprep.mubr.f32.mxu0 %v3952_v38 }
 0x115   :  { %555 = vmatprep.subr.mxu0 %v471_v44 }
 0x116   :  { %556 = vmatpush1.msra.mxu0 %v470_v45 }
 0x117   :  { %557 = vmatprep.subr.mxu0 %v467_v47 }
 0x118   :  { %558 = vmatpush1.msra.mxu0 %v466_v49 }
 0x119   :  { %559 = vmatprep.subr.mxu0 %v463_v51 }
 0x11a   :  { %560 = vmatpush1.msra.mxu0 %v462_v53 }
 0x11b   :  { %561 = vmatprep.subr.mxu0 %v459_v55 }
 0x11c   :  { %562 = vmatpush1.msra.mxu0 %v458_v57 }
 0x11d   :  { %563 = vmatprep.subr.mxu0 %v455_v59 }
 0x11e   :  { %564 = vmatpush1.msra.mxu0 %v454_v61 }
 0x11f   :  { %565 = vmatprep.subr.mxu0 %v451_v63 }
 0x120   :  { %566 = vmatpush1.msra.mxu0 %v450_v1 }
 0x121   :  { %567 = vmatprep.subr.mxu0 %v447_v3  ;;  %v3180_v3 = vld [vmem:[#allocation8 + $0x1e8] sm:$0xff] }
 0x122   :  { %568 = vmatpush1.msra.mxu0 %v446_v5  ;;  %4010 = vst [vmem:[#allocation19_spill] sm:$0xff] %v3180_v3  ;;  %v3186_v5 = vld [vmem:[#allocation8 + $0x1e0] sm:$0xff] }
 0x123   :  { %569 = vmatprep.subr.mxu0 %v443_v7  ;;  %v631_v7 = vld [vmem:[%s3942_s5 + $0x8] sm:$0xff] }
 0x124   :  { %570 = vmatpush1.msra.mxu0 %v442_v9  ;;  %v3201_v9 = vld [vmem:[#allocation8 + $0x1d8] sm:$0xff] }
 0x125   :  { %571 = vmatprep.subr.mxu0 %v439_v11  ;;  %v3207_v11 = vld [vmem:[#allocation8 + $0x1d0] sm:$0xff] }
 0x126   :  { %572 = vmatpush1.msra.mxu0 %v438_v13  ;;  %v3215_v13 = vld [vmem:[#allocation8 + $0x1a8] sm:$0xff] }
 0x127   :  { %573 = vmatprep.subr.mxu0 %v435_v15  ;;  %v3224_v15 = vld [vmem:[#allocation8 + $0x188] sm:$0xff] }
 0x128   :  { %574 = vmatpush1.msra.mxu0 %v434_v17  ;;  %v633_v17 = vld [vmem:[%s3942_s5 + $0x18] sm:$0xff] }
 0x129   :  { %575 = vmatprep.subr.mxu0 %v431_v19  ;;  %v3237_v19 = vld [vmem:[#allocation8 + $0x1b0] sm:$0xff] }
 0x12a   :  { %576 = vmatpush1.msra.mxu0 %v430_v21  ;;  %v3243_v21 = vld [vmem:[#allocation8 + $0x198] sm:$0xff] }
 0x12b   :  { %577 = vmatprep.subr.mxu0 %v427_v23  ;;  %v3251_v23 = vld [vmem:[#allocation8 + $0x190] sm:$0xff] }
 0x12c   :  { %578 = vmatpush1.msra.mxu0 %v426_v25  ;;  %v3260_v25 = vld [vmem:[#allocation8 + $0x178] sm:$0xff] }
 0x12d   :  { %579 = vmatprep.subr.mxu0 %v423_v27  ;;  %v2549_v39 = vpop.f32.mrf.mxu1  ;;  %v3266_v27 = vld [vmem:[#allocation8 + $0x170] sm:$0xff] }
 0x12e   :  { %580 = vmatpush1.msra.mxu0 %v422_v29  ;;  %v3272_v29 = vld [vmem:[#allocation8 + $0x158] sm:$0xff] }
 0x12f   :  { %581 = vmatprep.subr.mxu0 %v419_v31  ;;  %v307_v43 = vpop.f32.mrf.mxu1  ;;  %v3280_v31 = vld [vmem:[#allocation8 + $0x150] sm:$0xff] }
 0x130   :  { %582 = vmatpush1.msra.mxu0 %v418_v33  ;;  %v3287_v33 = vld [vmem:[#allocation8 + $0x120] sm:$0xff] }
 0x131   :  { %583 = vmatprep.subr.mxu0 %v415_v35  ;;  %v3293_v35 = vld [vmem:[#allocation8 + $0x108] sm:$0xff] }
 0x132   :  { %584 = vmatpush1.msra.mxu0 %v414_v37  ;;  %v3301_v37 = vld [vmem:[#allocation8 + $0x118] sm:$0xff] }
 0x1d3   :  { %v2584_v40 = vpop.f32.mrf.mxu0 }
 0x1d4   :  { %v388_v42 = vadd.f32 %v2584_v40, %v2549_v39  ;;  %v3305_v39 = vld [vmem:[#allocation8 + $0x100] sm:$0xff]  ;;  %v3307_v40 = vld [vmem:[#allocation8 + $0x110] sm:$0xff] }
 0x1d5   :  { %v382_v44 = vpop.f32.mrf.mxu0 }
 0x1d6   :  { %v399_v45 = vadd.f32 %v2378_v41, %v388_v42  ;;  %v383_v46 = vadd.f32 %v382_v44, %v307_v43  ;;  %v3316_v42 = vld [vmem:[#allocation8 + $0xe8] sm:$0xff]  ;;  %v3318_v43 = vld [vmem:[#allocation8 + $0xf8] sm:$0xff]  ;;  %v3322_v44 = vld [vmem:[#allocation8 + $0xe0] sm:$0xff] }
 0x1d8   :  { %v403_v47 = vmin.f32 %v399_v45, 0.0  ;;  %v398_v48 = vadd.f32 %v2378_v41, %v383_v46  ;;  %vm401_vm2 = vcmp.gt.f32.partialorder %v399_v45, 0.0  ;;  %v636_v41 = vld [vmem:[%s3942_s5 + $0x30] sm:$0xff]  ;;  %v3328_v46 = vld [vmem:[#allocation8 + $0xc8] sm:$0xff] }
 0x1da   :  { %v406_v49 = vmul.f32 1.442695, %v403_v47  ;;  %v402_v50 = vmin.f32 %v398_v48, 0.0  ;;  %vm400_vm1 = vcmp.gt.f32.partialorder %v398_v48, 0.0  ;;  %v3330_v47 = vld [vmem:[#allocation8 + $0xd8] sm:$0xff] }
 0x1dc   :  { %v404_v51 = vmul.f32 1.442695, %v402_v50  ;;  %2666 = vpow2.f32 %v406_v49  ;;  %v3338_v49 = vld [vmem:[#allocation8 + $0xd0] sm:$0xff]  ;;  %v637_v50 = vld [vmem:[%s3942_s5 + $0x38] sm:$0xff] }
 0x1dd   :  { %4013 = vst [vmem:[#allocation22_spill] sm:$0xff] %v3338_v49 }
 0x1de   :  { %2668 = vpow2.f32 %v404_v51  ;;  %v3347_v51 = vld [vmem:[#allocation8 + $0xa8] sm:$0xff] }
 0x1df   :  { %4014 = vst [vmem:[#allocation23_spill] sm:$0xff] %v3347_v51 }
 0x1e9   :  { %v2667_v52 = vpop.eup %2666 }
 0x1ea   :  { %v2380_v56 = vadd.f32 -1.0, %v2667_v52  ;;  %v3349_v52 = vld [vmem:[#allocation8 + $0xb8] sm:$0xff] }
 0x1eb   :  { %v2669_v53 = vpop.eup %2668  ;;  %4015 = vst [vmem:[#allocation24_spill] sm:$0xff] %v3349_v52 }
 0x1ec   :  { %v2379_v54 = vadd.f32 -1.0, %v2669_v53  ;;  %v3171_v57 = vsel %vm401_vm2, %v399_v45, %v2380_v56  ;;  %v3324_v45 = vld [vmem:[#allocation8 + $0xf0] sm:$0xff]  ;;  %v3353_v53 = vld [vmem:[#allocation8 + $0xa0] sm:$0xff]  ;;  %v3359_v56 = vld [vmem:[#allocation8 + $0x88] sm:$0xff] }
 0x1ed   :  { %4009 = vst [vmem:[#allocation18_spill] sm:$0xff] %v3171_v57  ;;  %4016 = vst [vmem:[#allocation25_spill] sm:$0xff] %v3353_v53 }
 0x1ee   :  { %v3165_v55 = vsel %vm400_vm1, %v398_v48, %v2379_v54  ;;  %v3336_v48 = vld [vmem:[#allocation8 + $0xc0] sm:$0xff]  ;;  %v3355_v54 = vld [vmem:[#allocation8 + $0xb0] sm:$0xff]  ;;  %4018 = vst [vmem:[#allocation27_spill] sm:$0xff] %v3359_v56 }
 0x1ef   :  { %4008 = vst [vmem:[#allocation17_spill] sm:$0xff] %v3165_v55  ;;  %541 = vmatmul.mubr.f32.vlgmr.msra.gmra.mxu1 %v3165_v55  ;;  %618 = vmatmul.mubr.f32.vlgmr.msra.gmra.mxu0 %v3165_v55  ;;  %4012 = vst [vmem:[#allocation21_spill] sm:$0xff] %v3336_v48  ;;  %v3423_v55 = vld [vmem:[#allocation8 + $0x18] sm:$0xff] }
 0x1f0   :  { %546 = vmatprep.mubr.f32.mxu1 %v3952_v38  ;;  %623 = vmatprep.mubr.f32.mxu0 %v3952_v38  ;;  %4017 = vst [vmem:[#allocation26_spill] sm:$0xff] %v3355_v54  ;;  %4035 = vst [vmem:[#allocation44_spill] sm:$0xff] %v3423_v55 }
 0x1f3   :  { %547 = vmatmul.mubr.f32.gmra.mxu1 %v3171_v57  ;;  %624 = vmatmul.mubr.f32.gmra.mxu0 %v3171_v57  ;;  %v3421_v57 = vld [vmem:[#allocation8 + $0x8] sm:$0xff] }
 0x1f4   :  { %756 = vmatprep.mubr.f32.mxu1 %v3952_v38  ;;  %881 = vmatprep.mubr.f32.mxu0 %v3952_v38  ;;  %4034 = vst [vmem:[#allocation43_spill] sm:$0xff] %v3421_v57 }
 0x2af   :  { %v542_v58 = vpop.f32.mrf.mxu1  ;;  %v619_v59 = vpop.f32.mrf.mxu0 }
 0x2b1   :  { %v544_v60 = vpop.f32.mrf.mxu1  ;;  %v621_v61 = vpop.f32.mrf.mxu0 }
 0x2b3   :  { %v548_v62 = vpop.f32.mrf.mxu1  ;;  %v625_v63 = vpop.f32.mrf.mxu0 }
 0x2b5   :  { %v550_v0 = vpop.f32.mrf.mxu1  ;;  %v627_v1 = vpop.f32.mrf.mxu0 }
 0x2b6   :  { %720 = vmatprep.subr.mxu1 %v550_v0  ;;  %845 = vmatprep.subr.mxu0 %v627_v1  ;;  %v3384_v0 = vld [vmem:[#allocation8 + $0x60] sm:$0xff]  ;;  %v3386_v1 = vld [vmem:[#allocation8 + $0x70] sm:$0xff] }
 0x2b7   :  { %721 = vmatpush1.msra.mxu1 %v548_v62  ;;  %846 = vmatpush1.msra.mxu0 %v625_v63  ;;  %v3378_v62 = vld [vmem:[#allocation8 + $0x68] sm:$0xff]  ;;  %v3380_v63 = vld [vmem:[#allocation8 + $0x78] sm:$0xff]  ;;  %4024 = vst [vmem:[#allocation33_spill] sm:$0xff] %v3384_v0  ;;  %4025 = vst [vmem:[#allocation34_spill] sm:$0xff] %v3386_v1 }
 0x2b8   :  { %722 = vmatprep.subr.mxu1 %v544_v60  ;;  %847 = vmatprep.subr.mxu0 %v621_v61  ;;  %v3369_v60 = vld [vmem:[#allocation8 + $0x90] sm:$0xff]  ;;  %v638_v61 = vld [vmem:[%s3942_s5 + $0x40] sm:$0xff]  ;;  %4022 = vst [vmem:[#allocation31_spill] sm:$0xff] %v3378_v62  ;;  %4023 = vst [vmem:[#allocation32_spill] sm:$0xff] %v3380_v63 }
 0x2b9   :  { %723 = vmatpush1.msra.mxu1 %v542_v58  ;;  %848 = vmatpush1.msra.mxu0 %v619_v59  ;;  %v3361_v58 = vld [vmem:[#allocation8 + $0x98] sm:$0xff]  ;;  %v3367_v59 = vld [vmem:[#allocation8 + $0x80] sm:$0xff]  ;;  %4021 = vst [vmem:[#allocation30_spill] sm:$0xff] %v3369_v60 }
 0x2ba   :  { %2381 = vmatmul.mubr.msk.f32.vlgmr.msra.gmra.mxu1 %vm127_vm0, %v630_v2  ;;  %2391 = vmatmul.mubr.msk.f32.vlgmr.msra.gmra.mxu0 %vm127_vm0, %v630_v2  ;;  %4019 = vst [vmem:[#allocation28_spill] sm:$0xff] %v3361_v58  ;;  %4020 = vst [vmem:[#allocation29_spill] sm:$0xff] %v3367_v59  ;;  %v3390_v2 = vld [vmem:[#allocation8 + $0x48] sm:$0xff] }
 0x2bb   :  { %762 = vmatprep.mubr.f32.mxu1 %v3952_v38  ;;  %887 = vmatprep.mubr.f32.mxu0 %v3952_v38  ;;  %4026 = vst [vmem:[#allocation35_spill] sm:$0xff] %v3390_v2 }
 0x2bc   :  { %1057 = vmatprep.subr.mxu1 %v3180_v3  ;;  %1134 = vmatprep.subr.mxu0 %v3182_v4 }
 0x2bd   :  { %1058 = vmatpush1.msra.mxu1 %v3186_v5  ;;  %1135 = vmatpush1.msra.mxu0 %v3188_v6 }
 0x2be   :  { %2382 = vmatmul.mubr.msk.f32.gmra.mxu1 %vm127_vm0, %v631_v7  ;;  %2392 = vmatmul.mubr.msk.f32.gmra.mxu0 %vm127_vm0, %v631_v7  ;;  %v3392_v7 = vld [vmem:[#allocation8 + $0x58] sm:$0xff] }
 0x2bf   :  { %768 = vmatprep.mubr.f32.mxu1 %v3952_v38  ;;  %893 = vmatprep.mubr.f32.mxu0 %v3952_v38  ;;  %4027 = vst [vmem:[#allocation36_spill] sm:$0xff] %v3392_v7 }
 0x2c0   :  { %1059 = vmatprep.subr.mxu1 %v3198_v8  ;;  %1136 = vmatprep.subr.mxu0 %v3201_v9 }
 0x2c1   :  { %1060 = vmatpush1.msra.mxu1 %v3205_v10  ;;  %1137 = vmatpush1.msra.mxu0 %v3207_v11 }
 0x2c2   :  { %2383 = vmatmul.mubr.msk.f32.gmra.mxu1 %vm127_vm0, %v632_v12  ;;  %2393 = vmatmul.mubr.msk.f32.gmra.mxu0 %vm127_vm0, %v632_v12  ;;  %v3398_v12 = vld [vmem:[#allocation8 + $0x40] sm:$0xff] }
 0x2c3   :  { %1061 = vmatprep.subr.mxu1 %v3215_v13  ;;  %774 = vmatprep.mubr.f32.mxu1 %v3952_v38  ;;  %4028 = vst [vmem:[#allocation37_spill] sm:$0xff] %v3398_v12 }
 0x2c4   :  { %1062 = vmatpush1.msra.mxu1 %v3219_v14  ;;  %899 = vmatprep.mubr.f32.mxu0 %v3952_v38 }
 0x2c5   :  { %1063 = vmatprep.subr.mxu1 %v3224_v15  ;;  %1138 = vmatprep.subr.mxu0 %v3226_v16 }
 0x2c6   :  { %2384 = vmatmul.mubr.msk.f32.gmra.mxu1 %vm127_vm0, %v633_v17  ;;  %2394 = vmatmul.mubr.msk.f32.gmra.mxu0 %vm127_vm0, %v633_v17  ;;  %v3400_v17 = vld [vmem:[#allocation8 + $0x50] sm:$0xff] }
 0x2c7   :  { %1064 = vmatpush1.msra.mxu1 %v3235_v18  ;;  %1139 = vmatpush1.msra.mxu0 %v3237_v19  ;;  %4029 = vst [vmem:[#allocation38_spill] sm:$0xff] %v3400_v17 }
 0x2c8   :  { %1065 = vmatprep.subr.mxu1 %v3241_v20  ;;  %1140 = vmatprep.subr.mxu0 %v3243_v21 }
 0x2c9   :  { %780 = vmatprep.mubr.f32.mxu1 %v3952_v38  ;;  %905 = vmatprep.mubr.f32.mxu0 %v3952_v38 }
 0x2ca   :  { %1066 = vmatpush1.msra.mxu1 %v3249_v22  ;;  %1141 = vmatpush1.msra.mxu0 %v3251_v23 }
 0x2cb   :  { %2385 = vmatmul.mubr.msk.f32.gmra.mxu1 %vm127_vm0, %v634_v24  ;;  %2395 = vmatmul.mubr.msk.f32.gmra.mxu0 %vm127_vm0, %v634_v24  ;;  %v639_v24 = vld [vmem:[%s3942_s5 + $0x48] sm:$0xff] }
 0x2cc   :  { %1142 = vmatprep.subr.mxu0 %v3260_v25  ;;  %1067 = vmatprep.subr.mxu1 %v3262_v26 }
 0x2cd   :  { %1143 = vmatpush1.msra.mxu0 %v3266_v27  ;;  %1068 = vmatpush1.msra.mxu1 %v3268_v28 }
 0x2ce   :  { %1144 = vmatprep.subr.mxu0 %v3272_v29  ;;  %786 = vmatprep.mubr.f32.mxu1 %v3952_v38 }
 0x2cf   :  { %911 = vmatprep.mubr.f32.mxu0 %v3952_v38  ;;  %1069 = vmatprep.subr.mxu1 %v3276_v30 }
 0x2d0   :  { %1145 = vmatpush1.msra.mxu0 %v3280_v31  ;;  %2386 = vmatmul.mubr.msk.f32.gmra.mxu1 %vm127_vm0, %v635_v32 }
 0x2d1   :  { %2396 = vmatmul.mubr.msk.f32.gmra.mxu0 %vm127_vm0, %v635_v32  ;;  %1070 = vmatpush1.msra.mxu1 %v3287_v33  ;;  %v3409_v32 = vld [vmem:[#allocation8 + $0x28] sm:$0xff] }
 0x2d2   :  { %1146 = vmatprep.subr.mxu0 %v3291_v34  ;;  %1071 = vmatprep.subr.mxu1 %v3293_v35  ;;  %4030 = vst [vmem:[#allocation39_spill] sm:$0xff] %v3409_v32 }
 0x2d3   :  { %1147 = vmatpush1.msra.mxu0 %v3297_v36  ;;  %792 = vmatprep.mubr.f32.mxu1 %v3952_v38 }
 0x2d4   :  { %1148 = vmatprep.subr.mxu0 %v3301_v37  ;;  %917 = vmatprep.mubr.f32.mxu0 %v3952_v38 }
 0x2d5   :  { %1072 = vmatpush1.msra.mxu1 %v3305_v39  ;;  %1149 = vmatpush1.msra.mxu0 %v3307_v40 }
 0x2d6   :  { %2387 = vmatmul.mubr.msk.f32.gmra.mxu1 %vm127_vm0, %v636_v41  ;;  %2397 = vmatmul.mubr.msk.f32.gmra.mxu0 %vm127_vm0, %v636_v41  ;;  %v3411_v41 = vld [vmem:[#allocation8 + $0x38] sm:$0xff] }
 0x2d7   :  { %1073 = vmatprep.subr.mxu1 %v3316_v42  ;;  %1150 = vmatprep.subr.mxu0 %v3318_v43  ;;  %4031 = vst [vmem:[#allocation40_spill] sm:$0xff] %v3411_v41 }
 0x2d8   :  { %1074 = vmatpush1.msra.mxu1 %v3322_v44  ;;  %1151 = vmatpush1.msra.mxu0 %v3324_v45 }
 0x2d9   :  { %1075 = vmatprep.subr.mxu1 %v3328_v46  ;;  %1152 = vmatprep.subr.mxu0 %v3330_v47 }
 0x2da   :  { %798 = vmatprep.mubr.f32.mxu1 %v3952_v38  ;;  %923 = vmatprep.mubr.f32.mxu0 %v3952_v38 }
 0x2db   :  { %1076 = vmatpush1.msra.mxu1 %v3336_v48  ;;  %1153 = vmatpush1.msra.mxu0 %v3338_v49 }
 0x2dc   :  { %2388 = vmatmul.mubr.msk.f32.gmra.mxu1 %vm127_vm0, %v637_v50  ;;  %2398 = vmatmul.mubr.msk.f32.gmra.mxu0 %vm127_vm0, %v637_v50  ;;  %v3415_v50 = vld [vmem:[#allocation8 + $0x20] sm:$0xff] }
 0x2dd   :  { %1077 = vmatprep.subr.mxu1 %v3347_v51  ;;  %1154 = vmatprep.subr.mxu0 %v3349_v52  ;;  %4032 = vst [vmem:[#allocation41_spill] sm:$0xff] %v3415_v50 }
 0x2de   :  { %1078 = vmatpush1.msra.mxu1 %v3353_v53  ;;  %1155 = vmatpush1.msra.mxu0 %v3355_v54 }
 0x2df   :  { %1079 = vmatprep.subr.mxu1 %v3359_v56  ;;  %1156 = vmatprep.subr.mxu0 %v3361_v58 }
 0x2e0   :  { %804 = vmatprep.mubr.f32.mxu1 %v3952_v38  ;;  %929 = vmatprep.mubr.f32.mxu0 %v3952_v38 }
 0x2e1   :  { %1080 = vmatpush1.msra.mxu1 %v3367_v59  ;;  %1157 = vmatpush1.msra.mxu0 %v3369_v60 }
 0x2e2   :  { %2389 = vmatmul.mubr.msk.f32.gmra.mxu1 %vm127_vm0, %v638_v61  ;;  %2399 = vmatmul.mubr.msk.f32.gmra.mxu0 %vm127_vm0, %v638_v61  ;;  %v3417_v61 = vld [vmem:[#allocation8 + $0x30] sm:$0xff] }
 0x2e3   :  { %1081 = vmatprep.subr.mxu1 %v3378_v62  ;;  %1158 = vmatprep.subr.mxu0 %v3380_v63  ;;  %4033 = vst [vmem:[#allocation42_spill] sm:$0xff] %v3417_v61 }
 0x2e4   :  { %1082 = vmatpush1.msra.mxu1 %v3384_v0  ;;  %1159 = vmatpush1.msra.mxu0 %v3386_v1 }
 0x2e5   :  { %1083 = vmatprep.subr.mxu1 %v3390_v2  ;;  %1160 = vmatprep.subr.mxu0 %v3392_v7 }
 0x2e6   :  { %810 = vmatprep.mubr.f32.mxu1 %v3952_v38  ;;  %935 = vmatprep.mubr.f32.mxu0 %v3952_v38  ;;  %v3427_v38 = vld [vmem:[#allocation8] sm:$0xff] }
 0x2e7   :  { %1084 = vmatpush1.msra.mxu1 %v3398_v12  ;;  %1161 = vmatpush1.msra.mxu0 %v3400_v17  ;;  %4036 = vst [vmem:[#allocation45_spill] sm:$0xff] %v3427_v38  ;;  %v3431_v17 = vld [vmem:[#allocation8 + $0x10] sm:$0xff] }
 0x2e8   :  { %2390 = vmatmul.mubr.msk.f32.gmra.mxu1 %vm127_vm0, %v639_v24  ;;  %2400 = vmatmul.mubr.msk.f32.gmra.mxu0 %vm127_vm0, %v639_v24  ;;  %4037 = vst [vmem:[#allocation46_spill] sm:$0xff] %v3431_v17  ;;  %v4038_v24 = vmov 0.0  }
 0x2e9   :  { %1085 = vmatprep.subr.mxu1 %v3409_v32  ;;  %1162 = vmatprep.subr.mxu0 %v3411_v41 }
 0x2ea   :  { %1086 = vmatpush1.msra.mxu1 %v3415_v50  ;;  %1163 = vmatpush1.msra.mxu0 %v3417_v61 }
 0x2eb   :  { %1087 = vmatprep.subr.mxu1 %v3421_v57  ;;  %1164 = vmatprep.subr.mxu0 %v3423_v55 }
 0x2ec   :  { %1088 = vmatpush1.msra.mxu1 %v3427_v38  ;;  %1121 = vmatprep.mubr.f32.mxu1 %v4038_v24 }
 0x2ed   :  { %1165 = vmatpush1.msra.mxu0 %v3431_v17  ;;  %1198 = vmatprep.mubr.f32.mxu0 %v4038_v24 }
 0x2ee   :  { %1122 = vmatmul.mubr.f32.vlgmr.msra.gmra.mxu1 %v4038_v24  ;;  %1199 = vmatmul.mubr.f32.vlgmr.msra.gmra.mxu0 %v4038_v24 }
 0x2ef   :  { %1127 = vmatprep.mubr.f32.mxu1 %v4038_v24  ;;  %1204 = vmatprep.mubr.f32.mxu0 %v4038_v24 }
 0x2f0   :  { %1278 = vmatprep.subr.mxu1 %v3180_v3  ;;  %1355 = vmatprep.subr.mxu0 %v3182_v4 }
 0x2f1   :  { %1279 = vmatpush1.msra.mxu1 %v3186_v5  ;;  %1356 = vmatpush1.msra.mxu0 %v3188_v6 }
 0x2f2   :  { %1128 = vmatmul.mubr.f32.gmra.mxu1 %v4038_v24  ;;  %1205 = vmatmul.mubr.f32.gmra.mxu0 %v4038_v24 }
 0x2f3   :  { %1280 = vmatprep.subr.mxu1 %v3198_v8  ;;  %1357 = vmatprep.subr.mxu0 %v3201_v9 }
 0x2f4   :  { %1281 = vmatpush1.msra.mxu1 %v3205_v10  ;;  %1358 = vmatpush1.msra.mxu0 %v3207_v11 }
 0x2f5   :  { %1282 = vmatprep.subr.mxu1 %v3215_v13  ;;  %1359 = vmatprep.subr.mxu0 %v3226_v16 }
 0x2f6   :  { %1283 = vmatpush1.msra.mxu1 %v3219_v14  ;;  %1360 = vmatpush1.msra.mxu0 %v3237_v19 }
 0x2f7   :  { %1284 = vmatprep.subr.mxu1 %v3224_v15  ;;  %1361 = vmatprep.subr.mxu0 %v3243_v21 }
 0x2f8   :  { %1285 = vmatpush1.msra.mxu1 %v3235_v18  ;;  %1362 = vmatpush1.msra.mxu0 %v3251_v23 }
 0x2f9   :  { %1286 = vmatprep.subr.mxu1 %v3241_v20  ;;  %1363 = vmatprep.subr.mxu0 %v3260_v25 }
 0x2fa   :  { %1287 = vmatpush1.msra.mxu1 %v3249_v22  ;;  %1364 = vmatpush1.msra.mxu0 %v3266_v27 }
 0x2fb   :  { %1288 = vmatprep.subr.mxu1 %v3262_v26  ;;  %1365 = vmatprep.subr.mxu0 %v3272_v29 }
 0x2fc   :  { %1289 = vmatpush1.msra.mxu1 %v3268_v28  ;;  %1366 = vmatpush1.msra.mxu0 %v3280_v31 }
 0x2fd   :  { %1290 = vmatprep.subr.mxu1 %v3276_v30  ;;  %1367 = vmatprep.subr.mxu0 %v3291_v34 }
 0x2fe   :  { %1291 = vmatpush1.msra.mxu1 %v3287_v33  ;;  %1368 = vmatpush1.msra.mxu0 %v3297_v36 }
 0x2ff   :  { %1292 = vmatprep.subr.mxu1 %v3293_v35  ;;  %1369 = vmatprep.subr.mxu0 %v3301_v37 }
 0x300   :  { %1293 = vmatpush1.msra.mxu1 %v3305_v39  ;;  %1370 = vmatpush1.msra.mxu0 %v3307_v40 }
 0x301   :  { %1294 = vmatprep.subr.mxu1 %v3316_v42  ;;  %1371 = vmatprep.subr.mxu0 %v3318_v43 }
 0x302   :  { %1295 = vmatpush1.msra.mxu1 %v3322_v44  ;;  %1372 = vmatpush1.msra.mxu0 %v3324_v45 }
 0x303   :  { %1296 = vmatprep.subr.mxu1 %v3328_v46  ;;  %1373 = vmatprep.subr.mxu0 %v3330_v47 }
 0x304   :  { %1297 = vmatpush1.msra.mxu1 %v3336_v48  ;;  %1374 = vmatpush1.msra.mxu0 %v3338_v49 }
 0x305   :  { %1298 = vmatprep.subr.mxu1 %v3347_v51  ;;  %1375 = vmatprep.subr.mxu0 %v3349_v52 }
 0x306   :  { %1299 = vmatpush1.msra.mxu1 %v3353_v53  ;;  %1376 = vmatpush1.msra.mxu0 %v3355_v54 }
 0x307   :  { %1300 = vmatprep.subr.mxu1 %v3359_v56  ;;  %1377 = vmatprep.subr.mxu0 %v3361_v58  ;;  %v4039_v56 = vld [vmem:[#allocation38_spill] sm:$0xff] }
 0x308   :  { %1301 = vmatpush1.msra.mxu1 %v3367_v59  ;;  %1378 = vmatpush1.msra.mxu0 %v3369_v60 }
 0x309   :  { %1302 = vmatprep.subr.mxu1 %v3378_v62  ;;  %1379 = vmatprep.subr.mxu0 %v3380_v63 }
 0x30a   :  { %1303 = vmatpush1.msra.mxu1 %v3384_v0  ;;  %1380 = vmatpush1.msra.mxu0 %v3386_v1 }
 0x30b   :  { %1304 = vmatprep.subr.mxu1 %v3390_v2  ;;  %1381 = vmatprep.subr.mxu0 %v3392_v7 }
 0x30c   :  { %1305 = vmatpush1.msra.mxu1 %v3398_v12  ;;  %1382 = vmatpush1.msra.mxu0 %v4039_v56 }
 0x30d   :  { %1306 = vmatprep.subr.mxu1 %v3409_v32  ;;  %1383 = vmatprep.subr.mxu0 %v3411_v41  ;;  %v642_v41 = vlaneseq }
 0x30e   :  { %1307 = vmatpush1.msra.mxu1 %v3415_v50  ;;  %1384 = vmatpush1.msra.mxu0 %v3417_v61 }
 0x30f   :  { %1308 = vmatprep.subr.mxu1 %v3421_v57  ;;  %1385 = vmatprep.subr.mxu0 %v3423_v55  ;;  %v643_v50 = vshrl.u32 %v642_v41, 7 }
 0x310   :  { %1309 = vmatpush1.msra.mxu1 %v3427_v38  ;;  %1342 = vmatprep.mubr.f32.mxu1 %v4038_v24 }
 0x311   :  { %1386 = vmatpush1.msra.mxu0 %v3431_v17  ;;  %1419 = vmatprep.mubr.f32.mxu0 %v4038_v24  ;;  %v644_v38 = vsub.s32 0, %v643_v50  ;;  %v652_v56 = vsub.s32 2, %v643_v50  ;;  %v640_v17 = vld [vmem:[%s3945_s8] sm:$0xf]  ;;  %v656_v41 = vsub.s32 3, %v643_v50 }
 0x312   :  { %1499 = vmatprep.subr.mxu1 %v3180_v3  ;;  %1576 = vmatprep.subr.mxu0 %v3182_v4  ;;  %v648_v4 = vsub.s32 1, %v643_v50 }
 0x313   :  { %v3532_v1 = vrot.slane %v640_v17, %v644_v38  ;;  %v3534_v0 = vrot.slane %v640_v17, %v652_v56  ;;  %v3538_v59 = vrot.slane %v640_v17, %v656_v41 }
 0x314   :  { %v3536_v60 = vrot.slane %v640_v17, %v648_v4 }
 0x37a   :  { %v3513_v32 = vpop.f32.mrf.mxu1  ;;  %v3515_v61 = vpop.f32.mrf.mxu0 }
 0x37c   :  { %v3517_v57 = vpop.f32.mrf.mxu1  ;;  %v3519_v55 = vpop.f32.mrf.mxu0 }
 0x37e   :  { %v3524_v12 = vpop.f32.mrf.mxu1  ;;  %v3526_v3 = vpop.f32.mrf.mxu0 }
 0x380   :  { %v3528_v7 = vpop.f32.mrf.mxu1  ;;  %v3530_v2 = vpop.f32.mrf.mxu0 }
 0x382   :  { %v770_v63 = vpop.f32.mrf.mxu1  ;;  %v895_v62 = vpop.f32.mrf.mxu0 }
 0x383   :  { %v3541_v58 = vadd.f32 %v770_v63, %v3532_v1  ;;  %v3544_v54 = vadd.f32 %v895_v62, %v3534_v0 }
 0x384   :  { %v772_v50 = vpop.f32.mrf.mxu1  ;;  %v897_v53 = vpop.f32.mrf.mxu0 }
 0x385   :  { %4040 = vst [vmem:[#allocation47_spill] sm:$0xff] %v3541_v58  ;;  %4041 = vst [vmem:[#allocation48_spill] sm:$0xff] %v3544_v54  ;;  %v3547_v52 = vadd.f32 %v772_v50, %v3536_v60  ;;  %v3550_v38 = vadd.f32 %v897_v53, %v3538_v59 }
 0x386   :  { %v776_v56 = vpop.f32.mrf.mxu1  ;;  %v901_v51 = vpop.f32.mrf.mxu0 }
 0x387   :  { %4042 = vst [vmem:[#allocation49_spill] sm:$0xff] %v3547_v52  ;;  %4043 = vst [vmem:[#allocation50_spill] sm:$0xff] %v3550_v38  ;;  %v3553_v4 = vadd.f32 %v776_v56, %v3532_v1  ;;  %v3556_v17 = vadd.f32 %v901_v51, %v3534_v0 }
 0x388   :  { %v778_v63 = vpop.f32.mrf.mxu1  ;;  %v903_v41 = vpop.f32.mrf.mxu0 }
 0x389   :  { %4044 = vst [vmem:[#allocation51_spill] sm:$0xff] %v3553_v4  ;;  %4045 = vst [vmem:[#allocation52_spill] sm:$0xff] %v3556_v17  ;;  %v3559_v62 = vadd.f32 %v778_v63, %v3536_v60  ;;  %v3562_v54 = vadd.f32 %v903_v41, %v3538_v59 }
 0x38b   :  { %4046 = vst [vmem:[#allocation53_spill] sm:$0xff] %v3559_v62  ;;  %4047 = vst [vmem:[#allocation54_spill] sm:$0xff] %v3562_v54  ;;  %v782_v50 = vpop.f32.mrf.mxu1  ;;  %v907_v52 = vpop.f32.mrf.mxu0 }
 0x38c   :  { %v3565_v53 = vadd.f32 %v782_v50, %v3532_v1  ;;  %v3568_v38 = vadd.f32 %v907_v52, %v3534_v0 }
 0x38d   :  { %v784_v56 = vpop.f32.mrf.mxu1  ;;  %v909_v4 = vpop.f32.mrf.mxu0 }
 0x38e   :  { %4048 = vst [vmem:[#allocation55_spill] sm:$0xff] %v3565_v53  ;;  %4049 = vst [vmem:[#allocation56_spill] sm:$0xff] %v3568_v38  ;;  %v3571_v51 = vadd.f32 %v784_v56, %v3536_v60  ;;  %v3574_v17 = vadd.f32 %v909_v4, %v3538_v59 }
 0x390   :  { %4050 = vst [vmem:[#allocation57_spill] sm:$0xff] %v3571_v51  ;;  %4051 = vst [vmem:[#allocation58_spill] sm:$0xff] %v3574_v17  ;;  %v788_v63 = vpop.f32.mrf.mxu1 }
 0x391   :  { %v3577_v41 = vadd.f32 %v788_v63, %v3532_v1  ;;  %v913_v54 = vpop.f32.mrf.mxu0 }
 0x392   :  { %v3580_v62 = vadd.f32 %v913_v54, %v3534_v0  ;;  %v790_v50 = vpop.f32.mrf.mxu1 }
 0x393   :  { %4052 = vst [vmem:[#allocation59_spill] sm:$0xff] %v3577_v41  ;;  %v3583_v52 = vadd.f32 %v790_v50, %v3536_v60  ;;  %v915_v38 = vpop.f32.mrf.mxu0 }
 0x394   :  { %4053 = vst [vmem:[#allocation60_spill] sm:$0xff] %v3580_v62  ;;  %v3586_v53 = vadd.f32 %v915_v38, %v3538_v59 }
 0x395   :  { %4054 = vst [vmem:[#allocation61_spill] sm:$0xff] %v3583_v52 }
 0x396   :  { %4055 = vst [vmem:[#allocation62_spill] sm:$0xff] %v3586_v53  ;;  %v794_v56 = vpop.f32.mrf.mxu1  ;;  %v919_v51 = vpop.f32.mrf.mxu0 }
 0x397   :  { %v3589_v4 = vadd.f32 %v794_v56, %v3532_v1  ;;  %v3592_v63 = vadd.f32 %v919_v51, %v3534_v0 }
 0x398   :  { %v796_v17 = vpop.f32.mrf.mxu1  ;;  %v921_v41 = vpop.f32.mrf.mxu0 }
 0x399   :  { %4056 = vst [vmem:[#allocation63_spill] sm:$0xff] %v3589_v4  ;;  %4057 = vst [vmem:[#allocation64_spill] sm:$0xff] %v3592_v63  ;;  %v3595_v54 = vadd.f32 %v796_v17, %v3536_v60  ;;  %v3598_v50 = vadd.f32 %v921_v41, %v3538_v59 }
 0x39b   :  { %4058 = vst [vmem:[#allocation65_spill] sm:$0xff] %v3595_v54  ;;  %4059 = vst [vmem:[#allocation66_spill] sm:$0xff] %v3598_v50 }
 0x39c   :  { %v800_v62 = vpop.f32.mrf.mxu1  ;;  %v925_v52 = vpop.f32.mrf.mxu0 }
 0x39d   :  { %v3601_v38 = vadd.f32 %v800_v62, %v3532_v1  ;;  %v3604_v53 = vadd.f32 %v925_v52, %v3534_v0 }
 0x39e   :  { %v802_v56 = vpop.f32.mrf.mxu1  ;;  %v927_v4 = vpop.f32.mrf.mxu0 }
 0x39f   :  { %4060 = vst [vmem:[#allocation67_spill] sm:$0xff] %v3601_v38  ;;  %4061 = vst [vmem:[#allocation68_spill] sm:$0xff] %v3604_v53  ;;  %v3607_v51 = vadd.f32 %v802_v56, %v3536_v60  ;;  %v3610_v63 = vadd.f32 %v927_v4, %v3538_v59 }
 0x3a1   :  { %4062 = vst [vmem:[#allocation69_spill] sm:$0xff] %v3607_v51  ;;  %4063 = vst [vmem:[#allocation70_spill] sm:$0xff] %v3610_v63 }
 0x3a2   :  { %v806_v17 = vpop.f32.mrf.mxu1  ;;  %v931_v54 = vpop.f32.mrf.mxu0 }
 0x3a3   :  { %v3613_v41 = vadd.f32 %v806_v17, %v3532_v1  ;;  %v3616_v50 = vadd.f32 %v931_v54, %v3534_v0 }
 0x3a4   :  { %v808_v62 = vpop.f32.mrf.mxu1  ;;  %v933_v38 = vpop.f32.mrf.mxu0 }
 0x3a5   :  { %4064 = vst [vmem:[#allocation71_spill] sm:$0xff] %v3613_v41  ;;  %4065 = vst [vmem:[#allocation72_spill] sm:$0xff] %v3616_v50  ;;  %v3619_v52 = vadd.f32 %v808_v62, %v3536_v60  ;;  %v3622_v53 = vadd.f32 %v933_v38, %v3538_v59  ;;  %v759_v38 = vadd.f32 %v3513_v32, %v3532_v1 }
 0x3a7   :  { %4066 = vst [vmem:[#allocation73_spill] sm:$0xff] %v3619_v52  ;;  %4067 = vst [vmem:[#allocation74_spill] sm:$0xff] %v3622_v53  ;;  %v761_v53 = vadd.f32 %v3517_v57, %v3536_v60 }
 0x3a8   :  { %v812_v56 = vpop.f32.mrf.mxu1  ;;  %v937_v51 = vpop.f32.mrf.mxu0 }
 0x3a9   :  { %v3625_v4 = vadd.f32 %v812_v56, %v3532_v1  ;;  %v3628_v63 = vadd.f32 %v937_v51, %v3534_v0  ;;  %v765_v51 = vadd.f32 %v3524_v12, %v3532_v1  ;;  %v886_v1 = vadd.f32 %v3519_v55, %v3538_v59 }
 0x3aa   :  { %v814_v17 = vpop.f32.mrf.mxu1  ;;  %v939_v41 = vpop.f32.mrf.mxu0 }
 0x3ab   :  { %4068 = vst [vmem:[#allocation75_spill] sm:$0xff] %v3625_v4  ;;  %4069 = vst [vmem:[#allocation76_spill] sm:$0xff] %v3628_v63  ;;  %v3631_v54 = vadd.f32 %v814_v17, %v3536_v60  ;;  %v3634_v50 = vadd.f32 %v939_v41, %v3538_v59  ;;  %v767_v41 = vadd.f32 %v3528_v7, %v3536_v60 }
 0x3ac   :  { %v892_v60 = vadd.f32 %v3530_v2, %v3538_v59 }
 0x3ad   :  { %4070 = vst [vmem:[#allocation77_spill] sm:$0xff] %v3631_v54  ;;  %4071 = vst [vmem:[#allocation78_spill] sm:$0xff] %v3634_v50 }
 0x3ae   :  { %v1123_v62 = vpop.f32.mrf.mxu1  ;;  %v1200_v4 = vpop.f32.mrf.mxu0 }
 0x3af   :  { %v1211_v56 = vadd.f32 %v1123_v62, %v759_v38 }
 0x3b0   :  { %v1125_v52 = vpop.f32.mrf.mxu1  ;;  %v1202_v54 = vpop.f32.mrf.mxu0 }
 0x3b1   :  { %v2401_v63 = vmul.f32 -1.442695, %v1211_v56  ;;  %v1212_v58 = vadd.f32 %v1125_v52, %v761_v53  ;;  %v1214_v12 = vadd.f32 %v1202_v54, %v886_v1  ;;  %v890_v56 = vadd.f32 %v3526_v3, %v3534_v0 }
 0x3b2   :  { %v1129_v17 = vpop.f32.mrf.mxu1  ;;  %v1206_v38 = vpop.f32.mrf.mxu0 }
 0x3b3   :  { %2670 = vpow2.f32 %v2401_v63  ;;  %v2403_v50 = vmul.f32 -1.442695, %v1212_v58  ;;  %v1215_v32 = vadd.f32 %v1129_v17, %v765_v51  ;;  %v884_v58 = vadd.f32 %v3515_v61, %v3534_v0 }
 0x3b4   :  { %v1131_v49 = vpop.f32.mrf.mxu1  ;;  %v1208_v53 = vpop.f32.mrf.mxu0  ;;  %v2405_v7 = vmul.f32 -1.442695, %v1214_v12  ;;  %v1217_v17 = vadd.f32 %v1206_v38, %v890_v56 }
 0x3b5   :  { %2672 = vpow2.f32 %v2403_v50  ;;  %v2402_v48 = vmul.f32 -1.442695, %v1215_v32  ;;  %v1216_v57 = vadd.f32 %v1131_v49, %v767_v41  ;;  %v1218_v63 = vadd.f32 %v1208_v53, %v892_v60 }
 0x3b6   :  { %v1213_v52 = vadd.f32 %v1200_v4, %v884_v58 }
 0x3b7   :  { %2674 = vpow2.f32 %v2402_v48  ;;  %v2404_v62 = vmul.f32 -1.442695, %v1216_v57  ;;  %v2406_v55 = vmul.f32 -1.442695, %v1218_v63 }
 0x3b9   :  { %2676 = vpow2.f32 %v2404_v62 }
 0x3ba   :  { %2678 = vpow2.f32 %v2405_v7 }
 0x3c0   :  { %v2671_v50 = vpop.eup %2670 }
 0x3c1   :  { %v1225_v49 = vadd.f32 1.0, %v2671_v50 }
 0x3c2   :  { %v2673_v48 = vpop.eup %2672 }
 0x3c3   :  { %2680 = vrcp.f32 %v1225_v49  ;;  %v1237_v54 = vadd.f32 1.0, %v2673_v48 }
 0x3c4   :  { %v2675_v51 = vpop.eup %2674  ;;  %2682 = vtanh.f32 %v1213_v52 }
 0x3c5   :  { %2684 = vrcp.f32 %v1237_v54  ;;  %v1226_v59 = vadd.f32 1.0, %v2675_v51  ;;  %v4094_v51 = vld [vmem:[#allocation43_spill] sm:$0xff] }
 0x3c6   :  { %v2677_v2 = vpop.eup %2676  ;;  %2686 = vpow2.f32 %v2406_v55 }
 0x3c7   :  { %2688 = vrcp.f32 %v1226_v59  ;;  %v1238_v61 = vadd.f32 1.0, %v2677_v2  ;;  %v2679_v4 = vpop.eup %2678  ;;  %v4096_v59 = vld [vmem:[#allocation45_spill] sm:$0xff]  ;;  %v4097_v2 = vld [vmem:[#allocation46_spill] sm:$0xff] }
 0x3c8   :  { %2690 = vtanh.f32 %v1217_v17  ;;  %v1251_v3 = vadd.f32 1.0, %v2679_v4  ;;  %v4095_v17 = vld [vmem:[#allocation44_spill] sm:$0xff] }
 0x3c9   :  { %2692 = vrcp.f32 %v1238_v61  ;;  %v4098_v61 = vld [vmem:[#allocation19_spill] sm:$0xff]  ;;  %v4099_v4 = vld [vmem:[#allocation20_spill] sm:$0xff] }
 0x3ca   :  { %2694 = vrcp.f32 %v1251_v3 }
 0x3d0   :  { %v2681_v41 = vpop.eup %2680 }
 0x3d1   :  { %v2683_v32 = vpop.eup %2682 }
 0x3d2   :  { %v2685_v57 = vpop.eup %2684  ;;  %v1259_v1 = vmul.f32 %v2683_v32, %v2681_v41  ;;  %v4100_v32 = vld [vmem:[#allocation47_spill] sm:$0xff] }
 0x3d3   :  { %v2687_v0 = vpop.eup %2686  ;;  %v1257_v62 = vmul.f32 0.0, %v2685_v57 }
 0x3d4   :  { %v2689_v12 = vpop.eup %2688  ;;  %v1252_v58 = vadd.f32 1.0, %v2687_v0 }
 0x3d5   :  { %v2691_v53 = vpop.eup %2690  ;;  %v3652_v60 = vadd.f32 %v1259_v1, %v1257_v62  ;;  %v4101_v1 = vld [vmem:[#allocation49_spill] sm:$0xff] }
 0x3d6   :  { %v2693_v38 = vpop.eup %2692  ;;  %v1260_v63 = vmul.f32 %v2691_v53, %v2689_v12 }
 0x3d7   :  { %2696 = vtanh.f32 %v3652_v60  ;;  %v1258_v7 = vmul.f32 0.0, %v2693_v38  ;;  %v2695_v52 = vpop.eup %2694 }
 0x3d8   :  { %2698 = vrcp.f32 %v1252_v58 }
 0x3d9   :  { %v3655_v50 = vadd.f32 %v1260_v63, %v1258_v7  ;;  %v4102_v7 = vld [vmem:[#allocation51_spill] sm:$0xff] }
 0x3db   :  { %2700 = vtanh.f32 %v3655_v50 }
 0x3e4   :  { %v2697_v49 = vpop.eup %2696 }
 0x3e5   :  { %v1265_v48 = vmul.f32 %v2697_v49, %v2695_v52  ;;  %v2699_v56 = vpop.eup %2698 }
 0x3e7   :  { %1343 = vmatmul.mubr.f32.vlgmr.msra.gmra.mxu1 %v1265_v48  ;;  %1420 = vmatmul.mubr.f32.vlgmr.msra.gmra.mxu0 %v1265_v48  ;;  %v4103_v48 = vld [vmem:[#allocation53_spill] sm:$0xff] }
 0x3e8   :  { %v2701_v55 = vpop.eup %2700  ;;  %1348 = vmatprep.mubr.f32.mxu1 %v4038_v24  ;;  %1425 = vmatprep.mubr.f32.mxu0 %v4038_v24 }
 0x3e9   :  { %v1266_v54 = vmul.f32 %v2701_v55, %v2699_v56  ;;  %1500 = vmatpush1.msra.mxu1 %v3186_v5  ;;  %1577 = vmatpush1.msra.mxu0 %v3188_v6  ;;  %v4072_v5 = vld [vmem:[#allocation21_spill] sm:$0xff]  ;;  %v4073_v6 = vld [vmem:[#allocation22_spill] sm:$0xff] }
 0x3ea   :  { %1501 = vmatprep.subr.mxu1 %v3198_v8  ;;  %1578 = vmatprep.subr.mxu0 %v3201_v9  ;;  %v4074_v8 = vld [vmem:[#allocation23_spill] sm:$0xff]  ;;  %v4075_v9 = vld [vmem:[#allocation24_spill] sm:$0xff] }
 0x3eb   :  { %1349 = vmatmul.mubr.f32.gmra.mxu1 %v1266_v54  ;;  %1426 = vmatmul.mubr.f32.gmra.mxu0 %v1266_v54 }
 0x3ec   :  { %1502 = vmatpush1.msra.mxu1 %v3205_v10  ;;  %1579 = vmatpush1.msra.mxu0 %v3207_v11  ;;  %v4076_v10 = vld [vmem:[#allocation25_spill] sm:$0xff]  ;;  %v4077_v11 = vld [vmem:[#allocation26_spill] sm:$0xff] }
 0x3ed   :  { %1503 = vmatprep.subr.mxu1 %v3215_v13  ;;  %1580 = vmatprep.subr.mxu0 %v3226_v16  ;;  %v4078_v13 = vld [vmem:[#allocation27_spill] sm:$0xff]  ;;  %v4081_v16 = vld [vmem:[#allocation30_spill] sm:$0xff] }
 0x3ee   :  { %1504 = vmatpush1.msra.mxu1 %v3219_v14  ;;  %1581 = vmatpush1.msra.mxu0 %v3237_v19  ;;  %v4079_v14 = vld [vmem:[#allocation28_spill] sm:$0xff] }
 0x3ef   :  { %1505 = vmatprep.subr.mxu1 %v3224_v15  ;;  %1582 = vmatprep.subr.mxu0 %v3243_v21  ;;  %v4080_v15 = vld [vmem:[#allocation29_spill] sm:$0xff]  ;;  %v4083_v19 = vld [vmem:[#allocation32_spill] sm:$0xff]  ;;  %v4085_v21 = vld [vmem:[#allocation34_spill] sm:$0xff] }
 0x3f0   :  { %1506 = vmatpush1.msra.mxu1 %v3235_v18  ;;  %1583 = vmatpush1.msra.mxu0 %v3251_v23  ;;  %v4082_v18 = vld [vmem:[#allocation31_spill] sm:$0xff]  ;;  %v4087_v23 = vld [vmem:[#allocation36_spill] sm:$0xff] }
 0x3f1   :  { %1507 = vmatprep.subr.mxu1 %v3241_v20  ;;  %1584 = vmatprep.subr.mxu0 %v3260_v25  ;;  %v4084_v20 = vld [vmem:[#allocation33_spill] sm:$0xff] }
 0x3f2   :  { %1508 = vmatpush1.msra.mxu1 %v3249_v22  ;;  %1585 = vmatpush1.msra.mxu0 %v3266_v27  ;;  %v4086_v22 = vld [vmem:[#allocation35_spill] sm:$0xff]  ;;  %v4088_v25 = vld [vmem:[#allocation37_spill] sm:$0xff] }
 0x3f3   :  { %1509 = vmatprep.subr.mxu1 %v3262_v26  ;;  %1586 = vmatprep.subr.mxu0 %v3272_v29  ;;  %v4089_v26 = vld [vmem:[#allocation38_spill] sm:$0xff]  ;;  %v4090_v27 = vld [vmem:[#allocation39_spill] sm:$0xff]  ;;  %v4092_v29 = vld [vmem:[#allocation41_spill] sm:$0xff] }
 0x3f4   :  { %1510 = vmatpush1.msra.mxu1 %v3268_v28  ;;  %1587 = vmatpush1.msra.mxu0 %v3280_v31  ;;  %v4091_v28 = vld [vmem:[#allocation40_spill] sm:$0xff] }
 0x3f5   :  { %1511 = vmatprep.subr.mxu1 %v3276_v30  ;;  %1588 = vmatprep.subr.mxu0 %v3291_v34  ;;  %v4093_v30 = vld [vmem:[#allocation42_spill] sm:$0xff] }
 0x3f6   :  { %1512 = vmatpush1.msra.mxu1 %v3287_v33  ;;  %1589 = vmatpush1.msra.mxu0 %v3297_v36 }
 0x3f7   :  { %1513 = vmatprep.subr.mxu1 %v3293_v35  ;;  %1590 = vmatprep.subr.mxu0 %v3301_v37 }
 0x3f8   :  { %1514 = vmatpush1.msra.mxu1 %v3305_v39  ;;  %1591 = vmatpush1.msra.mxu0 %v3307_v40 }
 0x3f9   :  { %1515 = vmatprep.subr.mxu1 %v3316_v42  ;;  %1592 = vmatprep.subr.mxu0 %v3318_v43 }
 0x3fa   :  { %1516 = vmatpush1.msra.mxu1 %v3322_v44  ;;  %1593 = vmatpush1.msra.mxu0 %v3324_v45 }
 0x3fb   :  { %1517 = vmatprep.subr.mxu1 %v3328_v46  ;;  %1594 = vmatprep.subr.mxu0 %v3330_v47 }
 0x3fc   :  { %1518 = vmatpush1.msra.mxu1 %v4072_v5  ;;  %1595 = vmatpush1.msra.mxu0 %v4073_v6 }
 0x3fd   :  { %1519 = vmatprep.subr.mxu1 %v4074_v8  ;;  %1596 = vmatprep.subr.mxu0 %v4075_v9 }
 0x3fe   :  { %1520 = vmatpush1.msra.mxu1 %v4076_v10  ;;  %1597 = vmatpush1.msra.mxu0 %v4077_v11 }
 0x3ff   :  { %1521 = vmatprep.subr.mxu1 %v4078_v13  ;;  %1598 = vmatprep.subr.mxu0 %v4079_v14 }
 0x400   :  { %1522 = vmatpush1.msra.mxu1 %v4080_v15  ;;  %1599 = vmatpush1.msra.mxu0 %v4081_v16 }
 0x401   :  { %1523 = vmatprep.subr.mxu1 %v4082_v18  ;;  %1600 = vmatprep.subr.mxu0 %v4083_v19 }
 0x402   :  { %1524 = vmatpush1.msra.mxu1 %v4084_v20  ;;  %1601 = vmatpush1.msra.mxu0 %v4085_v21 }
 0x403   :  { %1525 = vmatprep.subr.mxu1 %v4086_v22  ;;  %1602 = vmatprep.subr.mxu0 %v4087_v23 }
 0x404   :  { %1526 = vmatpush1.msra.mxu1 %v4088_v25  ;;  %1603 = vmatpush1.msra.mxu0 %v4089_v26 }
 0x405   :  { %1527 = vmatprep.subr.mxu1 %v4090_v27  ;;  %1604 = vmatprep.subr.mxu0 %v4091_v28 }
 0x406   :  { %1528 = vmatpush1.msra.mxu1 %v4092_v29  ;;  %1605 = vmatpush1.msra.mxu0 %v4093_v30 }
 0x407   :  { %1529 = vmatprep.subr.mxu1 %v4094_v51  ;;  %1606 = vmatprep.subr.mxu0 %v4095_v17 }
 0x408   :  { %1530 = vmatpush1.msra.mxu1 %v4096_v59  ;;  %1563 = vmatprep.mubr.f32.mxu1 %v4038_v24 }
 0x409   :  { %1607 = vmatpush1.msra.mxu0 %v4097_v2  ;;  %1640 = vmatprep.mubr.f32.mxu0 %v4038_v24  ;;  %v4107_v2 = vld [vmem:[#allocation52_spill] sm:$0xff] }
 0x40a   :  { %1720 = vmatprep.subr.mxu1 %v4098_v61  ;;  %1797 = vmatprep.subr.mxu0 %v4099_v4  ;;  %v4104_v61 = vld [vmem:[#allocation50_spill] sm:$0xff] }
 0x4a7   :  { %v1344_v41 = vpop.f32.mrf.mxu1  ;;  %v1421_v3 = vpop.f32.mrf.mxu0 }
 0x4a8   :  { %v1432_v57 = vadd.f32 %v1344_v41, %v4100_v32  ;;  %v4105_v32 = vld [vmem:[#allocation48_spill] sm:$0xff] }
 0x4a9   :  { %v1346_v0 = vpop.f32.mrf.mxu1  ;;  %v1423_v58 = vpop.f32.mrf.mxu0 }
 0x4aa   :  { %v2407_v62 = vmul.f32 -1.442695, %v1432_v57  ;;  %v1433_v12 = vadd.f32 %v1346_v0, %v4101_v1  ;;  %v1435_v4 = vadd.f32 %v1423_v58, %v4104_v61  ;;  %v1434_v57 = vadd.f32 %v1421_v3, %v4105_v32 }
 0x4ab   :  { %v1350_v53 = vpop.f32.mrf.mxu1  ;;  %v1427_v55 = vpop.f32.mrf.mxu0 }
 0x4ac   :  { %2702 = vpow2.f32 %v2407_v62  ;;  %v2409_v38 = vmul.f32 -1.442695, %v1433_v12  ;;  %v1436_v63 = vadd.f32 %v1350_v53, %v4102_v7  ;;  %v2411_v0 = vmul.f32 -1.442695, %v1435_v4  ;;  %v4106_v62 = vld [vmem:[#allocation54_spill] sm:$0xff] }
 0x4ad   :  { %v1352_v52 = vpop.f32.mrf.mxu1  ;;  %v1429_v41 = vpop.f32.mrf.mxu0  ;;  %v1438_v53 = vadd.f32 %v1427_v55, %v4107_v2 }
 0x4ae   :  { %2704 = vpow2.f32 %v2409_v38  ;;  %v2408_v49 = vmul.f32 -1.442695, %v1436_v63  ;;  %v1437_v56 = vadd.f32 %v1352_v52, %v4103_v48  ;;  %v1439_v1 = vadd.f32 %v1429_v41, %v4106_v62 }
 0x4b0   :  { %2706 = vpow2.f32 %v2408_v49  ;;  %v2410_v54 = vmul.f32 -1.442695, %v1437_v56  ;;  %v2412_v63 = vmul.f32 -1.442695, %v1439_v1 }
 0x4b2   :  { %2708 = vpow2.f32 %v2410_v54 }
 0x4b3   :  { %2710 = vtanh.f32 %v1434_v57 }
 0x4b4   :  { %2712 = vpow2.f32 %v2411_v0 }
 0x4b9   :  { %v2703_v12 = vpop.eup %2702 }
 0x4ba   :  { %v1446_v7 = vadd.f32 1.0, %v2703_v12 }
 0x4bb   :  { %v2705_v38 = vpop.eup %2704 }
 0x4bc   :  { %2714 = vrcp.f32 %v1446_v7  ;;  %v1458_v52 = vadd.f32 1.0, %v2705_v38 }
 0x4bd   :  { %v2707_v49 = vpop.eup %2706  ;;  %2716 = vtanh.f32 %v1438_v53 }
 0x4be   :  { %2718 = vrcp.f32 %v1458_v52  ;;  %v1447_v58 = vadd.f32 1.0, %v2707_v49 }
 0x4bf   :  { %v2709_v48 = vpop.eup %2708  ;;  %2720 = vpow2.f32 %v2412_v63 }
 0x4c0   :  { %2722 = vrcp.f32 %v1447_v58  ;;  %v1459_v3 = vadd.f32 1.0, %v2709_v48  ;;  %v2711_v56 = vpop.eup %2710 }
 0x4c1   :  { %v2713_v54 = vpop.eup %2712 }
 0x4c2   :  { %2724 = vrcp.f32 %v1459_v3  ;;  %v1472_v41 = vadd.f32 1.0, %v2713_v54  ;;  %v3744_v3 = vld [vmem:[#allocation8 + $0x1e0] sm:$0xff]  ;;  %v3753_v54 = vld [vmem:[#allocation8 + $0x1d8] sm:$0xff] }
 0x4c4   :  { %2726 = vrcp.f32 %v1472_v41  ;;  %v3768_v41 = vld [vmem:[#allocation8 + $0x1a0] sm:$0xff] }
 0x4c9   :  { %v2715_v61 = vpop.eup %2714 }
 0x4ca   :  { %v2717_v2 = vpop.eup %2716  ;;  %v1480_v55 = vmul.f32 %v2715_v61, %v2711_v56  ;;  %v3750_v56 = vld [vmem:[#allocation8 + $0x1c8] sm:$0xff]  ;;  %v3756_v61 = vld [vmem:[#allocation8 + $0x1c0] sm:$0xff] }
 0x4cb   :  { %v2719_v4 = vpop.eup %2718 }
 0x4cc   :  { %v2721_v32 = vpop.eup %2720  ;;  %v1478_v57 = vmul.f32 %v2719_v4, %v3652_v60  ;;  %v3765_v4 = vld [vmem:[#allocation8 + $0x1b8] sm:$0xff] }
 0x4cd   :  { %v2723_v0 = vpop.eup %2722  ;;  %v1473_v53 = vadd.f32 1.0, %v2721_v32  ;;  %v3771_v32 = vld [vmem:[#allocation8 + $0x1b0] sm:$0xff] }
 0x4ce   :  { %v3735_v62 = vadd.f32 %v1480_v55, %v1478_v57  ;;  %v1481_v1 = vmul.f32 %v2723_v0, %v2717_v2  ;;  %v3759_v2 = vld [vmem:[#allocation8 + $0x1d0] sm:$0xff]  ;;  %v3762_v55 = vld [vmem:[#allocation8 + $0x1a8] sm:$0xff]  ;;  %v3777_v0 = vld [vmem:[#allocation8 + $0x198] sm:$0xff] }
 0x4cf   :  { %v2725_v12 = vpop.eup %2724  ;;  %v3774_v57 = vld [vmem:[#allocation8 + $0x188] sm:$0xff] }
 0x4d0   :  { %2728 = vtanh.f32 %v3735_v62  ;;  %v1479_v7 = vmul.f32 %v2725_v12, %v3655_v50  ;;  %v3747_v50 = vld [vmem:[#allocation8 + $0x1f0] sm:$0xff] }
 0x4d1   :  { %2730 = vrcp.f32 %v1473_v53  ;;  %v2727_v63 = vpop.eup %2726  ;;  %v3783_v12 = vld [vmem:[#allocation8 + $0x190] sm:$0xff]  ;;  %v3786_v53 = vld [vmem:[#allocation8 + $0x168] sm:$0xff] }
 0x4d2   :  { %v3739_v38 = vadd.f32 %v1481_v1, %v1479_v7  ;;  %v3780_v1 = vld [vmem:[#allocation8 + $0x180] sm:$0xff]  ;;  %v3789_v7 = vld [vmem:[#allocation8 + $0x178] sm:$0xff] }
 0x4d4   :  { %2732 = vtanh.f32 %v3739_v38 }
 0x4dd   :  { %v2729_v52 = vpop.eup %2728 }
 0x4de   :  { %v1486_v49 = vmul.f32 %v2729_v52, %v2727_v63  ;;  %v2731_v60 = vpop.eup %2730  ;;  %v3792_v63 = vld [vmem:[#allocation8 + $0x160] sm:$0xff]  ;;  %v3795_v52 = vld [vmem:[#allocation8 + $0x170] sm:$0xff] }
 0x4e0   :  { %1564 = vmatmul.mubr.f32.vlgmr.msra.gmra.mxu1 %v1486_v49  ;;  %1641 = vmatmul.mubr.f32.vlgmr.msra.gmra.mxu0 %v1486_v49  ;;  %v3798_v49 = vld [vmem:[#allocation8 + $0x148] sm:$0xff] }
 0x4e1   :  { %v2733_v58 = vpop.eup %2732  ;;  %1569 = vmatprep.mubr.f32.mxu1 %v4038_v24  ;;  %1646 = vmatprep.mubr.f32.mxu0 %v4038_v24 }
 0x4e2   :  { %v1487_v48 = vmul.f32 %v2733_v58, %v2731_v60  ;;  %1721 = vmatpush1.msra.mxu1 %v3744_v3  ;;  %1798 = vmatpush1.msra.mxu0 %v3747_v50  ;;  %v3801_v60 = vld [vmem:[#allocation8 + $0x158] sm:$0xff]  ;;  %v3804_v58 = vld [vmem:[#allocation8 + $0x140] sm:$0xff] }
 0x4e3   :  { %1722 = vmatprep.subr.mxu1 %v3750_v56  ;;  %1799 = vmatprep.subr.mxu0 %v3753_v54 }
 0x4e4   :  { %1570 = vmatmul.mubr.f32.gmra.mxu1 %v1487_v48  ;;  %1647 = vmatmul.mubr.f32.gmra.mxu0 %v1487_v48  ;;  %v3808_v48 = vld [vmem:[#allocation8 + $0x128] sm:$0xff] }
 0x4e5   :  { %1723 = vmatpush1.msra.mxu1 %v3756_v61  ;;  %1800 = vmatpush1.msra.mxu0 %v3759_v2 }
 0x4e6   :  { %1724 = vmatprep.subr.mxu1 %v3762_v55  ;;  %1801 = vmatprep.subr.mxu0 %v3765_v4 }
 0x4e7   :  { %1725 = vmatpush1.msra.mxu1 %v3768_v41  ;;  %1802 = vmatpush1.msra.mxu0 %v3771_v32 }
 0x4e8   :  { %1726 = vmatprep.subr.mxu1 %v3774_v57  ;;  %1803 = vmatprep.subr.mxu0 %v3777_v0 }
 0x4e9   :  { %1727 = vmatpush1.msra.mxu1 %v3780_v1  ;;  %1804 = vmatpush1.msra.mxu0 %v3783_v12 }
 0x4ea   :  { %1728 = vmatprep.subr.mxu1 %v3786_v53  ;;  %1805 = vmatprep.subr.mxu0 %v3789_v7 }
 0x4eb   :  { %1729 = vmatpush1.msra.mxu1 %v3792_v63  ;;  %1806 = vmatpush1.msra.mxu0 %v3795_v52 }
 0x4ec   :  { %1730 = vmatprep.subr.mxu1 %v3798_v49  ;;  %1807 = vmatprep.subr.mxu0 %v3801_v60 }
 0x4ed   :  { %1731 = vmatpush1.msra.mxu1 %v3804_v58  ;;  %1808 = vmatpush1.msra.mxu0 %v3280_v31  ;;  %v4108_v31 = vld [vmem:[#allocation46_spill] sm:$0xff] }
 0x4ee   :  { %1732 = vmatprep.subr.mxu1 %v3808_v48  ;;  %1809 = vmatprep.subr.mxu0 %v3291_v34  ;;  %v2861_v34 = vld [vmem:[#allocation8 + $0x1f8] sm:$0xff] }
 0x4ef   :  { %1733 = vmatpush1.msra.mxu1 %v3287_v33  ;;  %1810 = vmatpush1.msra.mxu0 %v3297_v36  ;;  %v2860_v33 = vld [vmem:[#allocation8 + $0x1e8] sm:$0xff]  ;;  %v4109_v36 = vld [vmem:[#allocation55_spill] sm:$0xff] }
 0x4f0   :  { %1734 = vmatprep.subr.mxu1 %v3293_v35  ;;  %1811 = vmatprep.subr.mxu0 %v3301_v37 }
 0x4f1   :  { %1735 = vmatpush1.msra.mxu1 %v3305_v39  ;;  %1812 = vmatpush1.msra.mxu0 %v3307_v40 }
 0x4f2   :  { %1736 = vmatprep.subr.mxu1 %v3316_v42  ;;  %1813 = vmatprep.subr.mxu0 %v3318_v43  ;;  %v4110_v43 = vld [vmem:[#allocation57_spill] sm:$0xff] }
 0x4f3   :  { %1737 = vmatpush1.msra.mxu1 %v3322_v44  ;;  %1814 = vmatpush1.msra.mxu0 %v3324_v45 }
 0x4f4   :  { %1738 = vmatprep.subr.mxu1 %v3328_v46  ;;  %1815 = vmatprep.subr.mxu0 %v3330_v47 }
 0x4f5   :  { %1739 = vmatpush1.msra.mxu1 %v4072_v5  ;;  %1816 = vmatpush1.msra.mxu0 %v4073_v6  ;;  %v4111_v5 = vld [vmem:[#allocation59_spill] sm:$0xff] }
 0x4f6   :  { %1740 = vmatprep.subr.mxu1 %v4074_v8  ;;  %1817 = vmatprep.subr.mxu0 %v4075_v9 }
 0x4f7   :  { %1741 = vmatpush1.msra.mxu1 %v4076_v10  ;;  %1818 = vmatpush1.msra.mxu0 %v4077_v11  ;;  %v4112_v10 = vld [vmem:[#allocation61_spill] sm:$0xff] }
 0x4f8   :  { %1742 = vmatprep.subr.mxu1 %v4078_v13  ;;  %1819 = vmatprep.subr.mxu0 %v4079_v14 }
 0x4f9   :  { %1743 = vmatpush1.msra.mxu1 %v4080_v15  ;;  %1820 = vmatpush1.msra.mxu0 %v4081_v16  ;;  %v4113_v15 = vld [vmem:[#allocation58_spill] sm:$0xff] }
 0x4fa   :  { %1744 = vmatprep.subr.mxu1 %v4082_v18  ;;  %1821 = vmatprep.subr.mxu0 %v4083_v19  ;;  %v4114_v19 = vld [vmem:[#allocation56_spill] sm:$0xff] }
 0x4fb   :  { %1745 = vmatpush1.msra.mxu1 %v4084_v20  ;;  %1822 = vmatpush1.msra.mxu0 %v4085_v21 }
 0x4fc   :  { %1746 = vmatprep.subr.mxu1 %v4086_v22  ;;  %1823 = vmatprep.subr.mxu0 %v4087_v23  ;;  %v4115_v22 = vld [vmem:[#allocation62_spill] sm:$0xff] }
 0x4fd   :  { %1747 = vmatpush1.msra.mxu1 %v4088_v25  ;;  %1824 = vmatpush1.msra.mxu0 %v4089_v26  ;;  %v4116_v26 = vld [vmem:[#allocation60_spill] sm:$0xff] }
 0x4fe   :  { %1748 = vmatprep.subr.mxu1 %v4090_v27  ;;  %1825 = vmatprep.subr.mxu0 %v4091_v28 }
 0x4ff   :  { %1749 = vmatpush1.msra.mxu1 %v4092_v29  ;;  %1826 = vmatpush1.msra.mxu0 %v4093_v30 }
 0x500   :  { %1750 = vmatprep.subr.mxu1 %v4094_v51  ;;  %1827 = vmatprep.subr.mxu0 %v4095_v17 }
 0x501   :  { %1751 = vmatpush1.msra.mxu1 %v4096_v59  ;;  %1784 = vmatprep.mubr.f32.mxu1 %v4038_v24 }
 0x502   :  { %1828 = vmatpush1.msra.mxu0 %v4108_v31  ;;  %1861 = vmatprep.mubr.f32.mxu0 %v4038_v24 }
 0x503   :  { %1941 = vmatprep.subr.mxu1 %v2860_v33  ;;  %2018 = vmatprep.subr.mxu0 %v2861_v34 }
 0x5a0   :  { %v1565_v35 = vpop.f32.mrf.mxu1  ;;  %v1642_v39 = vpop.f32.mrf.mxu0 }
 0x5a1   :  { %v1653_v37 = vadd.f32 %v1565_v35, %v4109_v36  ;;  %v1655_v20 = vadd.f32 %v1642_v39, %v4114_v19  ;;  %v2887_v19 = vld [vmem:[#allocation8 + $0x78] sm:$0xff] }
 0x5a2   :  { %v1567_v40 = vpop.f32.mrf.mxu1  ;;  %v1644_v47 = vpop.f32.mrf.mxu0 }
 0x5a3   :  { %v2413_v42 = vmul.f32 -1.442695, %v1653_v37  ;;  %v1654_v44 = vadd.f32 %v1567_v40, %v4110_v43  ;;  %v1656_v16 = vadd.f32 %v1644_v47, %v4113_v15 }
 0x5a4   :  { %v1571_v45 = vpop.f32.mrf.mxu1  ;;  %v1648_v13 = vpop.f32.mrf.mxu0 }
 0x5a5   :  { %2734 = vpow2.f32 %v2413_v42  ;;  %v2415_v46 = vmul.f32 -1.442695, %v1654_v44  ;;  %v1657_v6 = vadd.f32 %v1571_v45, %v4111_v5  ;;  %v2417_v21 = vmul.f32 -1.442695, %v1656_v16  ;;  %v2885_v16 = vld [vmem:[#allocation8 + $0x90] sm:$0xff] }
 0x5a6   :  { %v1573_v8 = vpop.f32.mrf.mxu1  ;;  %v1650_v18 = vpop.f32.mrf.mxu0  ;;  %v1659_v27 = vadd.f32 %v1648_v13, %v4116_v26  ;;  %v2893_v26 = vld [vmem:[#allocation8 + $0x50] sm:$0xff] }
 0x5a7   :  { %2736 = vpow2.f32 %v2415_v46  ;;  %v2414_v9 = vmul.f32 -1.442695, %v1657_v6  ;;  %v1658_v11 = vadd.f32 %v1573_v8, %v4112_v10  ;;  %v1660_v23 = vadd.f32 %v1650_v18, %v4115_v22  ;;  %v2886_v18 = vld [vmem:[#allocation8 + $0x68] sm:$0xff] }
 0x5a8   :  { %v2890_v22 = vld [vmem:[#allocation8 + $0x48] sm:$0xff] }
 0x5a9   :  { %2738 = vpow2.f32 %v2414_v9  ;;  %v2416_v14 = vmul.f32 -1.442695, %v1658_v11  ;;  %v2418_v30 = vmul.f32 -1.442695, %v1660_v23  ;;  %v2891_v23 = vld [vmem:[#allocation8 + $0x58] sm:$0xff] }
 0x5ab   :  { %2740 = vpow2.f32 %v2416_v14 }
 0x5ac   :  { %2742 = vtanh.f32 %v1655_v20  ;;  %v2888_v20 = vld [vmem:[#allocation8 + $0x60] sm:$0xff] }
 0x5ad   :  { %2744 = vpow2.f32 %v2417_v21  ;;  %v2889_v21 = vld [vmem:[#allocation8 + $0x70] sm:$0xff] }
 0x5b2   :  { %v2735_v25 = vpop.eup %2734 }
 0x5b3   :  { %v1667_v28 = vadd.f32 1.0, %v2735_v25  ;;  %v2892_v25 = vld [vmem:[#allocation8 + $0x40] sm:$0xff] }
 0x5b4   :  { %v2737_v29 = vpop.eup %2736 }
 0x5b5   :  { %2746 = vrcp.f32 %v1667_v28  ;;  %v1679_v51 = vadd.f32 1.0, %v2737_v29  ;;  %v2895_v28 = vld [vmem:[#allocation8 + $0x38] sm:$0xff]  ;;  %v2896_v29 = vld [vmem:[#allocation8 + $0x20] sm:$0xff] }
 0x5b6   :  { %v2739_v17 = vpop.eup %2738  ;;  %2748 = vtanh.f32 %v1659_v27  ;;  %v2894_v27 = vld [vmem:[#allocation8 + $0x28] sm:$0xff] }
 0x5b7   :  { %2750 = vrcp.f32 %v1679_v51  ;;  %v1668_v59 = vadd.f32 1.0, %v2739_v17  ;;  %v2898_v51 = vld [vmem:[#allocation8 + $0x8] sm:$0xff]  ;;  %v2899_v17 = vld [vmem:[#allocation8 + $0x18] sm:$0xff] }
 0x5b8   :  { %v2741_v31 = vpop.eup %2740  ;;  %2752 = vpow2.f32 %v2418_v30  ;;  %v2897_v30 = vld [vmem:[#allocation8 + $0x30] sm:$0xff] }
 0x5b9   :  { %2754 = vrcp.f32 %v1668_v59  ;;  %v1680_v33 = vadd.f32 1.0, %v2741_v31  ;;  %v2743_v34 = vpop.eup %2742  ;;  %v2900_v59 = vld [vmem:[#allocation8] sm:$0xff]  ;;  %v2901_v31 = vld [vmem:[#allocation8 + $0x10] sm:$0xff] }
 0x5ba   :  { %v2745_v35 = vpop.eup %2744 }
 0x5bb   :  { %2756 = vrcp.f32 %v1680_v33  ;;  %v1693_v42 = vadd.f32 1.0, %v2745_v35  ;;  %v3894_v33 = vld [vmem:[#allocation11 + $0x78] sm:$0xff]  ;;  %v4117_v35 = vld [vmem:[#allocation63_spill] sm:$0xff] }
 0x5bd   :  { %2758 = vrcp.f32 %v1693_v42  ;;  %v4118_v42 = vld [vmem:[#allocation65_spill] sm:$0xff] }
 0x5c2   :  { %v2747_v36 = vpop.eup %2746 }
 0x5c3   :  { %v2749_v37 = vpop.eup %2748  ;;  %v1701_v39 = vmul.f32 %v2747_v36, %v2743_v34 }
 0x5c4   :  { %v2751_v40 = vpop.eup %2750 }
 0x5c5   :  { %v2753_v43 = vpop.eup %2752  ;;  %v1699_v44 = vmul.f32 %v2751_v40, %v3735_v62 }
 0x5c6   :  { %v2755_v45 = vpop.eup %2754  ;;  %v1694_v6 = vadd.f32 1.0, %v2753_v43 }
 0x5c7   :  { %v3861_v46 = vadd.f32 %v1701_v39, %v1699_v44  ;;  %v1702_v47 = vmul.f32 %v2755_v45, %v2749_v37 }
 0x5c8   :  { %v2757_v5 = vpop.eup %2756 }
 0x5c9   :  { %2760 = vtanh.f32 %v3861_v46  ;;  %v1700_v8 = vmul.f32 %v2757_v5, %v3739_v38  ;;  %v2862_v38 = vld [vmem:[#allocation8 + $0x150] sm:$0xff] }
 0x5ca   :  { %2762 = vrcp.f32 %v1694_v6  ;;  %v2759_v10 = vpop.eup %2758  ;;  %v4119_v5 = vld [vmem:[#allocation67_spill] sm:$0xff] }
 0x5cb   :  { %v3865_v9 = vadd.f32 %v1702_v47, %v1700_v8 }
 0x5cd   :  { %2764 = vtanh.f32 %v3865_v9 }
 0x5d6   :  { %v2761_v11 = vpop.eup %2760 }
 0x5d7   :  { %v1707_v13 = vmul.f32 %v2761_v11, %v2759_v10  ;;  %v2763_v62 = vpop.eup %2762  ;;  %v4120_v11 = vld [vmem:[#allocation69_spill] sm:$0xff] }
 0x5d9   :  { %1785 = vmatmul.mubr.f32.vlgmr.msra.gmra.mxu1 %v1707_v13  ;;  %1862 = vmatmul.mubr.f32.vlgmr.msra.gmra.mxu0 %v1707_v13 }
 0x5da   :  { %v2765_v14 = vpop.eup %2764  ;;  %1790 = vmatprep.mubr.f32.mxu1 %v4038_v24  ;;  %1867 = vmatprep.mubr.f32.mxu0 %v4038_v24 }
 0x5db   :  { %v1708_v15 = vmul.f32 %v2765_v14, %v2763_v62  ;;  %1942 = vmatpush1.msra.mxu1 %v3744_v3  ;;  %2019 = vmatpush1.msra.mxu0 %v3747_v50  ;;  %v2863_v3 = vld [vmem:[#allocation8 + $0x138] sm:$0xff]  ;;  %v2864_v50 = vld [vmem:[#allocation8 + $0x120] sm:$0xff] }
 0x5dc   :  { %1943 = vmatprep.subr.mxu1 %v3750_v56  ;;  %2020 = vmatprep.subr.mxu0 %v3753_v54  ;;  %v2865_v56 = vld [vmem:[#allocation8 + $0x130] sm:$0xff]  ;;  %v2866_v54 = vld [vmem:[#allocation8 + $0x108] sm:$0xff] }
 0x5dd   :  { %1791 = vmatmul.mubr.f32.gmra.mxu1 %v1708_v15  ;;  %1868 = vmatmul.mubr.f32.gmra.mxu0 %v1708_v15  ;;  %v4121_v15 = vld [vmem:[#allocation66_spill] sm:$0xff] }
 0x5de   :  { %1944 = vmatpush1.msra.mxu1 %v3756_v61  ;;  %2021 = vmatpush1.msra.mxu0 %v3759_v2  ;;  %v2867_v61 = vld [vmem:[#allocation8 + $0x118] sm:$0xff]  ;;  %v2868_v2 = vld [vmem:[#allocation8 + $0x100] sm:$0xff] }
 0x5df   :  { %1945 = vmatprep.subr.mxu1 %v3762_v55  ;;  %2022 = vmatprep.subr.mxu0 %v3765_v4  ;;  %v2869_v55 = vld [vmem:[#allocation8 + $0x110] sm:$0xff]  ;;  %v2870_v4 = vld [vmem:[#allocation8 + $0xe8] sm:$0xff] }
 0x5e0   :  { %1946 = vmatpush1.msra.mxu1 %v3768_v41  ;;  %2023 = vmatpush1.msra.mxu0 %v3771_v32  ;;  %v2871_v41 = vld [vmem:[#allocation8 + $0xf8] sm:$0xff]  ;;  %v2872_v32 = vld [vmem:[#allocation8 + $0xe0] sm:$0xff] }
 0x5e1   :  { %1947 = vmatprep.subr.mxu1 %v3774_v57  ;;  %2024 = vmatprep.subr.mxu0 %v3777_v0  ;;  %v2873_v57 = vld [vmem:[#allocation8 + $0xf0] sm:$0xff]  ;;  %v2874_v0 = vld [vmem:[#allocation8 + $0xc8] sm:$0xff] }
 0x5e2   :  { %1948 = vmatpush1.msra.mxu1 %v3780_v1  ;;  %2025 = vmatpush1.msra.mxu0 %v3783_v12  ;;  %v2875_v1 = vld [vmem:[#allocation8 + $0xd8] sm:$0xff]  ;;  %v2876_v12 = vld [vmem:[#allocation8 + $0xc0] sm:$0xff] }
 0x5e3   :  { %1949 = vmatprep.subr.mxu1 %v3786_v53  ;;  %2026 = vmatprep.subr.mxu0 %v3789_v7  ;;  %v2877_v53 = vld [vmem:[#allocation8 + $0xd0] sm:$0xff]  ;;  %v2878_v7 = vld [vmem:[#allocation8 + $0xa8] sm:$0xff] }
 0x5e4   :  { %1950 = vmatpush1.msra.mxu1 %v3792_v63  ;;  %2027 = vmatpush1.msra.mxu0 %v3795_v52  ;;  %v2879_v63 = vld [vmem:[#allocation8 + $0xb8] sm:$0xff]  ;;  %v2880_v52 = vld [vmem:[#allocation8 + $0xa0] sm:$0xff] }
 0x5e5   :  { %1951 = vmatprep.subr.mxu1 %v3798_v49  ;;  %2028 = vmatprep.subr.mxu0 %v3801_v60  ;;  %v2881_v49 = vld [vmem:[#allocation8 + $0xb0] sm:$0xff]  ;;  %v2882_v60 = vld [vmem:[#allocation8 + $0x88] sm:$0xff] }
 0x5e6   :  { %1952 = vmatpush1.msra.mxu1 %v3804_v58  ;;  %2029 = vmatpush1.msra.mxu0 %v2862_v38  ;;  %v2883_v58 = vld [vmem:[#allocation8 + $0x98] sm:$0xff] }
 0x5e7   :  { %1953 = vmatprep.subr.mxu1 %v3808_v48  ;;  %2030 = vmatprep.subr.mxu0 %v2863_v3  ;;  %v2884_v48 = vld [vmem:[#allocation8 + $0x80] sm:$0xff] }
 0x5e8   :  { %1954 = vmatpush1.msra.mxu1 %v2864_v50  ;;  %2031 = vmatpush1.msra.mxu0 %v2865_v56  ;;  %v4122_v50 = vld [vmem:[#allocation64_spill] sm:$0xff] }
 0x5e9   :  { %1955 = vmatprep.subr.mxu1 %v2866_v54  ;;  %2032 = vmatprep.subr.mxu0 %v2867_v61  ;;  %v4123_v61 = vld [vmem:[#allocation70_spill] sm:$0xff] }
 0x5ea   :  { %1956 = vmatpush1.msra.mxu1 %v2868_v2  ;;  %2033 = vmatpush1.msra.mxu0 %v2869_v55 }
 0x5eb   :  { %1957 = vmatprep.subr.mxu1 %v2870_v4  ;;  %2034 = vmatprep.subr.mxu0 %v2871_v41  ;;  %v4124_v4 = vld [vmem:[#allocation68_spill] sm:$0xff] }
 0x5ec   :  { %1958 = vmatpush1.msra.mxu1 %v2872_v32  ;;  %2035 = vmatpush1.msra.mxu0 %v2873_v57 }
 0x5ed   :  { %1959 = vmatprep.subr.mxu1 %v2874_v0  ;;  %2036 = vmatprep.subr.mxu0 %v2875_v1 }
 0x5ee   :  { %1960 = vmatpush1.msra.mxu1 %v2876_v12  ;;  %2037 = vmatpush1.msra.mxu0 %v2877_v53 }
 0x5ef   :  { %1961 = vmatprep.subr.mxu1 %v2878_v7  ;;  %2038 = vmatprep.subr.mxu0 %v2879_v63 }
 0x5f0   :  { %1962 = vmatpush1.msra.mxu1 %v2880_v52  ;;  %2039 = vmatpush1.msra.mxu0 %v2881_v49 }
 0x5f1   :  { %1963 = vmatprep.subr.mxu1 %v2882_v60  ;;  %2040 = vmatprep.subr.mxu0 %v2883_v58 }
 0x5f2   :  { %1964 = vmatpush1.msra.mxu1 %v2884_v48  ;;  %2041 = vmatpush1.msra.mxu0 %v2885_v16 }
 0x5f3   :  { %1965 = vmatprep.subr.mxu1 %v2886_v18  ;;  %2042 = vmatprep.subr.mxu0 %v2887_v19 }
 0x5f4   :  { %1966 = vmatpush1.msra.mxu1 %v2888_v20  ;;  %2043 = vmatpush1.msra.mxu0 %v2889_v21 }
 0x5f5   :  { %1967 = vmatprep.subr.mxu1 %v2890_v22  ;;  %2044 = vmatprep.subr.mxu0 %v2891_v23 }
 0x5f6   :  { %1968 = vmatpush1.msra.mxu1 %v2892_v25  ;;  %2045 = vmatpush1.msra.mxu0 %v2893_v26 }
 0x5f7   :  { %1969 = vmatprep.subr.mxu1 %v2894_v27  ;;  %2046 = vmatprep.subr.mxu0 %v2895_v28 }
 0x5f8   :  { %1970 = vmatpush1.msra.mxu1 %v2896_v29  ;;  %2047 = vmatpush1.msra.mxu0 %v2897_v30 }
 0x5f9   :  { %1971 = vmatprep.subr.mxu1 %v2898_v51  ;;  %2048 = vmatprep.subr.mxu0 %v2899_v17 }
 0x5fa   :  { %1972 = vmatpush1.msra.mxu1 %v2900_v59  ;;  %2005 = vmatprep.mubr.f32.mxu1 %v4038_v24 }
 0x5fb   :  { %2049 = vmatpush1.msra.mxu0 %v2901_v31  ;;  %2082 = vmatprep.mubr.f32.mxu0 %v4038_v24  ;;  %v2180_v31 = vld [vmem:[#allocation11 + $0x68] sm:$0xff] }
 0x5fc   :  { %2585 = vmatprep.subr.mxu1 %v3894_v33 }
 0x699   :  { %v1786_v34 = vpop.f32.mrf.mxu1  ;;  %v1863_v37 = vpop.f32.mrf.mxu0 }
 0x69a   :  { %v1874_v36 = vadd.f32 %v1786_v34, %v4117_v35  ;;  %v1876_v56 = vadd.f32 %v1863_v37, %v4122_v50  ;;  %v2179_v34 = vld [vmem:[#allocation11 + $0x60] sm:$0xff]  ;;  %v2178_v35 = vld [vmem:[#allocation11 + $0x58] sm:$0xff]  ;;  %v2177_v37 = vld [vmem:[#allocation11 + $0x50] sm:$0xff] }
 0x69b   :  { %v1788_v39 = vpop.f32.mrf.mxu1  ;;  %v1865_v47 = vpop.f32.mrf.mxu0  ;;  %v2157_v50 = vld [vmem:[#allocation10 + $0x30] sm:$0xff] }
 0x69c   :  { %v2419_v40 = vmul.f32 -1.442695, %v1874_v36  ;;  %v1875_v43 = vadd.f32 %v1788_v39, %v4118_v42  ;;  %v1877_v38 = vadd.f32 %v1865_v47, %v4121_v15  ;;  %v4125_v36 = vld [vmem:[#allocation17_spill] sm:$0xff]  ;;  %v2172_v42 = vld [vmem:[#allocation11 + $0x28] sm:$0xff] }
 0x69d   :  { %v1792_v44 = vpop.f32.mrf.mxu1  ;;  %v1869_v62 = vpop.f32.mrf.mxu0  ;;  %v2175_v39 = vld [vmem:[#allocation11 + $0x40] sm:$0xff]  ;;  %v2168_v47 = vld [vmem:[#allocation11 + $0x8] sm:$0xff] }
 0x69e   :  { %2766 = vpow2.f32 %v2419_v40  ;;  %v2421_v45 = vmul.f32 -1.442695, %v1875_v43  ;;  %v1878_v6 = vadd.f32 %v1792_v44, %v4119_v5  ;;  %v2423_v54 = vmul.f32 -1.442695, %v1877_v38  ;;  %v2173_v40 = vld [vmem:[#allocation11 + $0x30] sm:$0xff]  ;;  %v2171_v43 = vld [vmem:[#allocation11 + $0x20] sm:$0xff] }
 0x69f   :  { %v1794_v8 = vpop.f32.mrf.mxu1  ;;  %v1871_v3 = vpop.f32.mrf.mxu0  ;;  %v1880_v41 = vadd.f32 %v1869_v62, %v4124_v4  ;;  %v2170_v44 = vld [vmem:[#allocation11 + $0x18] sm:$0xff]  ;;  %v2167_v5 = vld [vmem:[#allocation11] sm:$0xff]  ;;  %v2160_v15 = vld [vmem:[#allocation10 + $0x48] sm:$0xff] }
 0x6a0   :  { %2768 = vpow2.f32 %v2421_v45  ;;  %v2420_v10 = vmul.f32 -1.442695, %v1878_v6  ;;  %v1879_v13 = vadd.f32 %v1794_v8, %v4120_v11  ;;  %v1881_v2 = vadd.f32 %v1871_v3, %v4123_v61  ;;  %v2169_v45 = vld [vmem:[#allocation11 + $0x10] sm:$0xff]  ;;  %v4126_v6 = vld [vmem:[#allocation18_spill] sm:$0xff]  ;;  %v2166_v8 = vld [vmem:[#allocation10 + $0x78] sm:$0xff] }
 0x6a1   :  { %2620 = vmatprep.subr.mxu0 %v2166_v8  ;;  %v2164_v11 = vld [vmem:[#allocation10 + $0x68] sm:$0xff]  ;;  %v2162_v62 = vld [vmem:[#allocation10 + $0x58] sm:$0xff]  ;;  %v2159_v38 = vld [vmem:[#allocation10 + $0x40] sm:$0xff] }
 0x6a2   :  { %2770 = vpow2.f32 %v2420_v10  ;;  %v2422_v14 = vmul.f32 -1.442695, %v1879_v13  ;;  %v2424_v0 = vmul.f32 -1.442695, %v1881_v2  ;;  %v2165_v10 = vld [vmem:[#allocation10 + $0x70] sm:$0xff]  ;;  %v2163_v13 = vld [vmem:[#allocation10 + $0x60] sm:$0xff] }
 0x6a3   :  { %v2158_v3 = vld [vmem:[#allocation10 + $0x38] sm:$0xff]  ;;  %v2153_v2 = vld [vmem:[#allocation10 + $0x10] sm:$0xff]  ;;  %v2151_v4 = vld [vmem:[#allocation10] sm:$0xff] }
 0x6a4   :  { %2772 = vpow2.f32 %v2422_v14  ;;  %v2161_v14 = vld [vmem:[#allocation10 + $0x50] sm:$0xff]  ;;  %v2154_v61 = vld [vmem:[#allocation10 + $0x18] sm:$0xff] }
 0x6a5   :  { %2774 = vtanh.f32 %v1876_v56  ;;  %v2156_v56 = vld [vmem:[#allocation10 + $0x28] sm:$0xff] }
 0x6a6   :  { %2776 = vpow2.f32 %v2423_v54  ;;  %v2155_v54 = vld [vmem:[#allocation10 + $0x20] sm:$0xff] }
 0x6ab   :  { %v2767_v55 = vpop.eup %2766 }
 0x6ac   :  { %v1888_v32 = vadd.f32 1.0, %v2767_v55  ;;  %v2152_v55 = vld [vmem:[#allocation10 + $0x8] sm:$0xff] }
 0x6ad   :  { %v2769_v57 = vpop.eup %2768 }
 0x6ae   :  { %2778 = vrcp.f32 %v1888_v32  ;;  %v1900_v1 = vadd.f32 1.0, %v2769_v57  ;;  %v4127_v32 = vld [vmem:[#allocation71_spill] sm:$0xff] }
 0x6af   :  { %v2771_v12 = vpop.eup %2770  ;;  %2780 = vtanh.f32 %v1880_v41 }
 0x6b0   :  { %2782 = vrcp.f32 %v1900_v1  ;;  %v1889_v53 = vadd.f32 1.0, %v2771_v12 }
 0x6b1   :  { %v2773_v7 = vpop.eup %2772  ;;  %2784 = vpow2.f32 %v2424_v0 }
 0x6b2   :  { %2786 = vrcp.f32 %v1889_v53  ;;  %v1901_v63 = vadd.f32 1.0, %v2773_v7  ;;  %v2775_v52 = vpop.eup %2774  ;;  %v4128_v53 = vld [vmem:[#allocation73_spill] sm:$0xff] }
 0x6b3   :  { %v2777_v49 = vpop.eup %2776 }
 0x6b4   :  { %2788 = vrcp.f32 %v1901_v63  ;;  %v1914_v18 = vadd.f32 1.0, %v2777_v49 }
 0x6b6   :  { %2790 = vrcp.f32 %v1914_v18  ;;  %v4130_v18 = vld [vmem:[#allocation77_spill] sm:$0xff] }
 0x6bb   :  { %v2779_v60 = vpop.eup %2778 }
 0x6bc   :  { %v2781_v58 = vpop.eup %2780  ;;  %v1922_v48 = vmul.f32 %v2779_v60, %v2775_v52  ;;  %v4129_v60 = vld [vmem:[#allocation75_spill] sm:$0xff] }
 0x6bd   :  { %v2783_v16 = vpop.eup %2782 }
 0x6be   :  { %v2785_v19 = vpop.eup %2784  ;;  %v1920_v20 = vmul.f32 %v2783_v16, %v3861_v46  ;;  %v2181_v46 = vld [vmem:[#allocation11 + $0x70] sm:$0xff] }
 0x6bf   :  { %v2787_v21 = vpop.eup %2786  ;;  %v1915_v26 = vadd.f32 1.0, %v2785_v19 }
 0x6c0   :  { %v3906_v22 = vadd.f32 %v1922_v48, %v1920_v20  ;;  %v1923_v23 = vmul.f32 %v2787_v21, %v2781_v58 }
 0x6c1   :  { %v2789_v25 = vpop.eup %2788 }
 0x6c2   :  { %2792 = vtanh.f32 %v3906_v22  ;;  %v1921_v27 = vmul.f32 %v2789_v25, %v3865_v9 }
 0x6c3   :  { %2794 = vrcp.f32 %v1915_v26  ;;  %v2791_v29 = vpop.eup %2790 }
 0x6c4   :  { %v3910_v28 = vadd.f32 %v1923_v23, %v1921_v27  ;;  %v4131_v23 = vld [vmem:[#allocation74_spill] sm:$0xff]  ;;  %v4132_v27 = vld [vmem:[#allocation72_spill] sm:$0xff] }
 0x6c6   :  { %2796 = vtanh.f32 %v3910_v28 }
 0x6cf   :  { %v2793_v30 = vpop.eup %2792 }
 0x6d0   :  { %v1928_v51 = vmul.f32 %v2793_v30, %v2791_v29  ;;  %v2795_v17 = vpop.eup %2794 }
 0x6d2   :  { %2006 = vmatmul.mubr.f32.vlgmr.msra.gmra.mxu1 %v1928_v51  ;;  %2083 = vmatmul.mubr.f32.vlgmr.msra.gmra.mxu0 %v1928_v51  ;;  %v4133_v51 = vld [vmem:[#allocation78_spill] sm:$0xff] }
 0x6d3   :  { %v2797_v59 = vpop.eup %2796  ;;  %2586 = vmatpush3.msra.mxu1 %v3894_v33  ;;  %2011 = vmatprep.mubr.f32.mxu1 %v4038_v24  ;;  %v2176_v33 = vld [vmem:[#allocation11 + $0x48] sm:$0xff] }
 0x6d4   :  { %2587 = vmatprep.subr.mxu1 %v2181_v46  ;;  %2088 = vmatprep.mubr.f32.mxu0 %v4038_v24  ;;  %v1929_v9 = vmul.f32 %v2797_v59, %v2795_v17  ;;  %v2174_v24 = vld [vmem:[#allocation11 + $0x38] sm:$0xff] }
 0x6d5   :  { %2588 = vmatpush3.msra.mxu1 %v2181_v46  ;;  %2621 = vmatpush3.msra.mxu0 %v2166_v8  ;;  %v4134_v59 = vld [vmem:[#allocation76_spill] sm:$0xff] }
 0x6d6   :  { %2589 = vmatprep.subr.mxu1 %v2180_v31  ;;  %2012 = vmatmul.mubr.f32.gmra.mxu1 %v1929_v9 }
 0x6d7   :  { %2089 = vmatmul.mubr.f32.gmra.mxu0 %v1929_v9  ;;  %2590 = vmatpush3.msra.mxu1 %v2180_v31 }
 0x6d8   :  { %2591 = vmatprep.subr.mxu1 %v2179_v34  ;;  %2617 = vmatprep.mubr.f32.mxu1 %v4125_v36 }
 0x6d9   :  { %2592 = vmatpush3.msra.mxu1 %v2179_v34  ;;  %2622 = vmatprep.subr.mxu0 %v2165_v10 }
 0x6da   :  { %2593 = vmatprep.subr.mxu1 %v2178_v35  ;;  %2623 = vmatpush3.msra.mxu0 %v2165_v10 }
 0x6db   :  { %2594 = vmatpush3.msra.mxu1 %v2178_v35  ;;  %2624 = vmatprep.subr.mxu0 %v2164_v11 }
 0x6dc   :  { %2595 = vmatprep.subr.mxu1 %v2177_v37  ;;  %2625 = vmatpush3.msra.mxu0 %v2164_v11 }
 0x6dd   :  { %2596 = vmatpush3.msra.mxu1 %v2177_v37  ;;  %2626 = vmatprep.subr.mxu0 %v2163_v13 }
 0x6de   :  { %2597 = vmatprep.subr.mxu1 %v2176_v33  ;;  %2627 = vmatpush3.msra.mxu0 %v2163_v13 }
 0x6df   :  { %2598 = vmatpush3.msra.mxu1 %v2176_v33  ;;  %2628 = vmatprep.subr.mxu0 %v2162_v62 }
 0x6e0   :  { %2599 = vmatprep.subr.mxu1 %v2175_v39  ;;  %2629 = vmatpush3.msra.mxu0 %v2162_v62 }
 0x6e1   :  { %2600 = vmatpush3.msra.mxu1 %v2175_v39  ;;  %2630 = vmatprep.subr.mxu0 %v2161_v14 }
 0x6e2   :  { %2601 = vmatprep.subr.mxu1 %v2174_v24  ;;  %2631 = vmatpush3.msra.mxu0 %v2161_v14 }
 0x6e3   :  { %2602 = vmatpush3.msra.mxu1 %v2174_v24  ;;  %2632 = vmatprep.subr.mxu0 %v2160_v15 }
 0x6e4   :  { %2603 = vmatprep.subr.mxu1 %v2173_v40  ;;  %2633 = vmatpush3.msra.mxu0 %v2160_v15 }
 0x6e5   :  { %2604 = vmatpush3.msra.mxu1 %v2173_v40  ;;  %2634 = vmatprep.subr.mxu0 %v2159_v38 }
 0x6e6   :  { %2605 = vmatprep.subr.mxu1 %v2172_v42  ;;  %2635 = vmatpush3.msra.mxu0 %v2159_v38 }
 0x6e7   :  { %2606 = vmatpush3.msra.mxu1 %v2172_v42  ;;  %2636 = vmatprep.subr.mxu0 %v2158_v3 }
 0x6e8   :  { %2607 = vmatprep.subr.mxu1 %v2171_v43  ;;  %2637 = vmatpush3.msra.mxu0 %v2158_v3 }
 0x6e9   :  { %2608 = vmatpush3.msra.mxu1 %v2171_v43  ;;  %2638 = vmatprep.subr.mxu0 %v2157_v50 }
 0x6ea   :  { %2609 = vmatprep.subr.mxu1 %v2170_v44  ;;  %2639 = vmatpush3.msra.mxu0 %v2157_v50 }
 0x6eb   :  { %2610 = vmatpush3.msra.mxu1 %v2170_v44  ;;  %2640 = vmatprep.subr.mxu0 %v2156_v56 }
 0x6ec   :  { %2611 = vmatprep.subr.mxu1 %v2169_v45  ;;  %2641 = vmatpush3.msra.mxu0 %v2156_v56 }
 0x6ed   :  { %2612 = vmatpush3.msra.mxu1 %v2169_v45  ;;  %2642 = vmatprep.subr.mxu0 %v2155_v54 }
 0x6ee   :  { %2613 = vmatprep.subr.mxu1 %v2168_v47  ;;  %2643 = vmatpush3.msra.mxu0 %v2155_v54 }
 0x6ef   :  { %2614 = vmatpush3.msra.mxu1 %v2168_v47  ;;  %2644 = vmatprep.subr.mxu0 %v2154_v61 }
 0x6f0   :  { %2615 = vmatprep.subr.mxu1 %v2167_v5  ;;  %2645 = vmatpush3.msra.mxu0 %v2154_v61 }
 0x6f1   :  { %2616 = vmatpush3.msra.mxu1 %v2167_v5  ;;  %2646 = vmatprep.subr.mxu0 %v2153_v2 }
 0x6f2   :  { %2618 = vmatmul.mubr.f32.vlgmr.msra.gmra.mxu1 %v4126_v6  ;;  %2647 = vmatpush3.msra.mxu0 %v2153_v2 }
 0x6f3   :  { %2648 = vmatprep.subr.mxu0 %v2152_v55 }
 0x6f4   :  { %2649 = vmatpush3.msra.mxu0 %v2152_v55 }
 0x6f5   :  { %2650 = vmatprep.subr.mxu0 %v2151_v4 }
 0x6f6   :  { %2651 = vmatpush3.msra.mxu0 %v2151_v4 }
 0x792   :  { %v2007_v41 = vpop.f32.mrf.mxu1  ;;  %v2084_v0 = vpop.f32.mrf.mxu0 }
 0x793   :  { %v2095_v57 = vadd.f32 %v2007_v41, %v4127_v32  ;;  %v2097_v29 = vadd.f32 %v2084_v0, %v4132_v27 }
 0x794   :  { %v2009_v1 = vpop.f32.mrf.mxu1  ;;  %v2086_v49 = vpop.f32.mrf.mxu0 }
 0x795   :  { %v2425_v12 = vmul.f32 -1.442695, %v2095_v57  ;;  %v2096_v7 = vadd.f32 %v2009_v1, %v4128_v53  ;;  %v2098_v25 = vadd.f32 %v2086_v49, %v4131_v23 }
 0x796   :  { %v2013_v63 = vpop.f32.mrf.mxu1 }
 0x797   :  { %2798 = vpow2.f32 %v2425_v12  ;;  %v2427_v52 = vmul.f32 -1.442695, %v2096_v7  ;;  %v2099_v58 = vadd.f32 %v2013_v63, %v4129_v60  ;;  %v2090_v20 = vpop.f32.mrf.mxu0  ;;  %v2429_v30 = vmul.f32 -1.442695, %v2098_v25 }
 0x798   :  { %v2015_v48 = vpop.f32.mrf.mxu1  ;;  %v2101_v31 = vadd.f32 %v2090_v20, %v4134_v59 }
 0x799   :  { %2800 = vpow2.f32 %v2427_v52  ;;  %v2426_v16 = vmul.f32 -1.442695, %v2099_v58  ;;  %v2100_v19 = vadd.f32 %v2015_v48, %v4130_v18  ;;  %v2092_v26 = vpop.f32.mrf.mxu0 }
 0x79a   :  { %v2102_v46 = vadd.f32 %v2092_v26, %v4133_v51 }
 0x79b   :  { %2802 = vpow2.f32 %v2426_v16  ;;  %v2428_v21 = vmul.f32 -1.442695, %v2100_v19 }
 0x79c   :  { %v2430_v35 = vmul.f32 -1.442695, %v2102_v46 }
 0x79d   :  { %2804 = vpow2.f32 %v2428_v21 }
 0x79e   :  { %2806 = vtanh.f32 %v2097_v29 }
 0x79f   :  { %2808 = vpow2.f32 %v2429_v30 }
 0x7a4   :  { %v2799_v17 = vpop.eup %2798 }
 0x7a5   :  { %v2109_v9 = vadd.f32 1.0, %v2799_v17 }
 0x7a6   :  { %v2801_v34 = vpop.eup %2800 }
 0x7a7   :  { %2810 = vrcp.f32 %v2109_v9  ;;  %v2121_v36 = vadd.f32 1.0, %v2801_v34 }
 0x7a8   :  { %v2803_v37 = vpop.eup %2802  ;;  %2812 = vtanh.f32 %v2101_v31 }
 0x7a9   :  { %2814 = vrcp.f32 %v2121_v36  ;;  %v2110_v33 = vadd.f32 1.0, %v2803_v37 }
 0x7aa   :  { %v2805_v39 = vpop.eup %2804  ;;  %2816 = vpow2.f32 %v2430_v35 }
 0x7ab   :  { %2818 = vrcp.f32 %v2110_v33  ;;  %v2122_v24 = vadd.f32 1.0, %v2805_v39  ;;  %v2807_v40 = vpop.eup %2806 }
 0x7ac   :  { %v2809_v42 = vpop.eup %2808 }
 0x7ad   :  { %2820 = vrcp.f32 %v2122_v24  ;;  %v2135_v5 = vadd.f32 1.0, %v2809_v42 }
 0x7af   :  { %2822 = vrcp.f32 %v2135_v5 }
 0x7b4   :  { %v2811_v43 = vpop.eup %2810 }
 0x7b5   :  { %v2813_v44 = vpop.eup %2812  ;;  %v2143_v45 = vmul.f32 %v2811_v43, %v2807_v40 }
 0x7b6   :  { %v2815_v47 = vpop.eup %2814 }
 0x7b7   :  { %v2817_v6 = vpop.eup %2816  ;;  %v2141_v8 = vmul.f32 %v2815_v47, %v3906_v22  ;;  %v2619_v22 = vpop.f32.mrf.mxu1 }
 0x7b8   :  { %v2819_v10 = vpop.eup %2818  ;;  %v2136_v14 = vadd.f32 1.0, %v2817_v6 }
 0x7b9   :  { %v2144_v11 = vmul.f32 %v2819_v10, %v2813_v44  ;;  %v2145_v13 = vadd.f32 %v2143_v45, %v2141_v8  ;;  %v2249_v4 = vpop.f32.mrf.mxu1 }
 0x7ba   :  { %v2821_v62 = vpop.eup %2820 }
 0x7bb   :  { %v2142_v15 = vmul.f32 %v2821_v62, %v3910_v28  ;;  %2824 = vtanh.f32 %v2145_v13  ;;  %v2431_v28 = vld [vmem:[%s3947_s10] ss:$0 sm:$0xff] }
 0x7bc   :  { %2826 = vrcp.f32 %v2136_v14  ;;  %v2823_v3 = vpop.eup %2822 }
 0x7bd   :  { %v2146_v38 = vadd.f32 %v2144_v11, %v2142_v15 }
 0x7bf   :  { %2828 = vtanh.f32 %v2146_v38 }
 0x7c8   :  { %v2825_v50 = vpop.eup %2824 }
 0x7c9   :  { %v2149_v56 = vmul.f32 %v2825_v50, %v2823_v3  ;;  %v2827_v54 = vpop.eup %2826 }
 0x7cb   :  { %2652 = vmatprep.mubr.f32.mxu0 %v2149_v56 }
 0x7cc   :  { %v2829_v61 = vpop.eup %2828 }
 0x7cd   :  { %v2150_v2 = vmul.f32 %v2829_v61, %v2827_v54 }
 0x7cf   :  { %2653 = vmatmul.mubr.f32.vlgmr.msra.gmra.mxu0 %v2150_v2 }
 0x88f   :  { %v2654_v55 = vpop.f32.mrf.mxu0 }
 0x890   :  { %v2330_v57 = vadd.f32 %v2654_v55, %v2619_v22 }
 0x891   :  { %v2324_v41 = vpop.f32.mrf.mxu0 }
 0x892   :  { %v2325_v32 = vadd.f32 %v2324_v41, %v2249_v4  ;;  %v2341_v1 = vadd.f32 %v2431_v28, %v2330_v57 }
 0x894   :  { %v2340_v0 = vadd.f32 %v2431_v28, %v2325_v32 }
 0x896   :  { %2342 = vmax.xlane.f32.xlu0 %v2340_v0 }
 0x89a   :  { %2344 = vmax.xlane.f32.xlu0 %v2341_v1 }
 0x91f   :  { %v2343_v12 = vpop.xlane.xlu0 %2342 }
 0x920   :  { %v2346_v53 = vsub.f32 %v2340_v0, %v2343_v12 }
 0x922   :  { %v2348_v7 = vmul.f32 1.442695, %v2346_v53 }
 0x923   :  { %v2345_v63 = vpop.xlane.xlu0 %2344 }
 0x924   :  { %v2347_v52 = vsub.f32 %v2341_v1, %v2345_v63  ;;  %2830 = vpow2.f32 %v2348_v7 }
 0x926   :  { %v2350_v49 = vmul.f32 1.442695, %v2347_v52 }
 0x928   :  { %2832 = vpow2.f32 %v2350_v49 }
 0x931   :  { %v2831_v60 = vpop.eup %2830 }
 0x932   :  { %2352 = vadd.xlane.f32.xlu1 %v2831_v60 }
 0x935   :  { %v2833_v58 = vpop.eup %2832 }
 0x936   :  { %2354 = vadd.xlane.f32.xlu1 %v2833_v58 }
 0x9bb   :  { %v2353_v48 = vpop.xlane.xlu1 %2352 }
 0x9bc   :  { %2834 = vlog2.f32 %v2353_v48 }
 0x9bf   :  { %v2355_v16 = vpop.xlane.xlu1 %2354 }
 0x9c0   :  { %2836 = vlog2.f32 %v2355_v16 }
 0x9c9   :  { %v2835_v18 = vpop.eup %2834 }
 0x9ca   :  { %v2357_v19 = vmul.f32 0.6931472, %v2835_v18 }
 0x9cc   :  { %v2360_v20 = vsub.f32 %v2346_v53, %v2357_v19 }
 0x9cd   :  { %v2837_v21 = vpop.eup %2836 }
 0x9ce   :  { %2362 = vst [vmem:[%s3949_s12] sm:$0xff] %v2360_v20  ;;  %v2359_v23 = vmul.f32 0.6931472, %v2837_v21 }
 0x9d0   :  { %v2361_v25 = vsub.f32 %v2347_v52, %v2359_v23 }
 0x9d2   :  { %2363 = vst [vmem:[%s3949_s12 + $0x8] sm:$0xff] %v2361_v25 }
 0x9d3   :  { %2368 = vsyncpa [#allocation4], 1 }
 0x9d4   :  { %2369 = vsyncpa [#allocation6], 1 }
 0x9d5   :  { %2370 = vsyncpa [#allocation9], 1 }
 0x9d6   :  { %2371 = vsyncpa [#allocation12], 1 }

</bundles_post_ra>
